<compile_context>
chip_gen: v7x
topology: tpu7x:2x2x1
jax: 0.10.0
libtpu: 0.0.40
codegen_flags: <defaults>
</compile_context>

<pallas_src>
import functools

import jax
import jax.numpy as jnp
import numpy as np
from jax import lax
from jax.experimental import pallas as pl
from jax.experimental.pallas import tpu as pltpu


def _dot(a, b):
    return jnp.dot(a, b, preferred_element_type=jnp.float32)


def ggnn_kernel(h0_ref, anno_ref, adj_ref, bias_ref,
                c_ref, whrz_ref, wth_ref,
                wo1h_ref, wo1a_ref, bo1_ref, wo2s_ref, bo2s_ref,
                out_ref, *, BN, D, C, T):
    """One grid program handles Bb batch elements (BN = Bb * n_node rows)."""
    h0 = h0_ref[...]            # (BN, D)       initial node states for this batch block
    adj = adj_ref[...]          # (C*BN, BN)    block-diag (over batch) adjacency, rows = (edge/dir, batch, dst)
    bias_c = bias_ref[...]      # (BN, 3D)      step-constant gate bias (deg-weighted edge bias + b_r|b_z|b_t)
    whrz = whrz_ref[...]        # (D, 3D)       h contribution to r/z pre-activations (t-block zero)
    wth = wth_ref[...]          # (D, D)        W_t rows acting on (r * h)

    def step(_, h):
        # one aggregation matmul for all edge types / directions / batches in the block
        p = _dot(adj, h)                                              # (C*BN, D)
        # accumulate gate pre-activations; all slices static & sublane-aligned
        g = _dot(h, whrz) + bias_c                                    # (BN, 3D): [r | z | tanh-a]
        for c in range(C):
            g = g + _dot(p[c * BN:(c + 1) * BN, :], c_ref[c * D:(c + 1) * D, :])
        rz = jax.nn.sigmoid(g[:, 0:2 * D])                            # EUP
        r = rz[:, 0:D]
        z = rz[:, D:2 * D]
        h_hat = jnp.tanh(g[:, 2 * D:3 * D] + _dot(r * h, wth))
        return h + z * (h_hat - h)                                    # GRU blend, 1 VALU op saved

    h = lax.fori_loop(0, T, step, h0, unroll=True)

    # output MLP: Linear(D+A, HID) -> sigmoid -> (Linear(HID, out) + sum) folded to a row vector
    o1 = jax.nn.sigmoid(_dot(h, wo1h_ref[...])
                        + _dot(anno_ref[...], wo1a_ref[...])
                        + bo1_ref[...])                               # (BN, HID)
    # (1, HID) x (BN, HID)^T -> (1, BN): lane-dense output row, reduction on the MXU
    row = lax.dot_general(wo2s_ref[...], o1,
                          dimension_numbers=(((1,), (1,)), ((), ())),
                          preferred_element_type=jnp.float32)         # (1, BN)
    out_ref[...] = (row + bo2s_ref[...]).reshape(1, 1, BN)


def _precompute(params, adj_mat, *, B_pad, Bb, N, D, E):
    """Host-side (free XLA) weight/bias/adjacency repacking. Step-independent."""
    C = 2 * E
    f32 = jnp.float32
    num_blocks = B_pad // Bb
    w_r, w_z, w_t = params['w_r'], params['w_z'], params['w_t']       # each (3D, D)

    # gate weights with r/z/t stacked along the output dim:
    # rows 0:D act on a_in, D:2D on a_out, 2D:3D on h
    wa = jnp.concatenate([w_r, w_z, w_t], axis=1)                     # (3D, 3D)
    wa_in, wa_out = wa[0:D], wa[D:2 * D]

    # composed (edge transform @ gate) weights, one (D, 3D) block per dir/edge type
    c_blocks = [params['w_in'][e] @ wa_in for e in range(E)]
    c_blocks += [params['w_out'][e] @ wa_out for e in range(E)]
    c_cat = jnp.concatenate(c_blocks, axis=0)                         # (C*D, 3D)
    # h contribution to r/z pre-acts (tanh's h-term goes through r*h separately -> zeros)
    w_h_rz = jnp.concatenate([w_r[2 * D:], w_z[2 * D:], jnp.zeros((D, D), f32)], axis=1)  # (D, 3D)

    # adjacency repack: (B, N, C*N) -> per-batch-block block-diagonal (C*Bb*N, Bb*N)
    # rows ordered (edge/dir c, batch b, dst n), cols ordered (batch b, src m)
    adj4 = adj_mat.astype(f32).reshape(B_pad, N, C, N)                # (b, n, c, m)
    adj5 = adj4.reshape(num_blocks, Bb, N, C, N)
    adj_t = jnp.transpose(adj5, (0, 3, 1, 2, 4))                      # (k, c, b, n, m)
    eye = jnp.eye(Bb, dtype=f32)
    adj_bd = jnp.einsum('kcbnm,bp->kcbnpm', adj_t, eye)               # batch block-diagonal
    adj_bd = adj_bd.reshape(num_blocks * C * Bb * N, Bb * N)

    # step-constant gate bias: degree-weighted edge biases + (b_r | b_z | b_t)
    b_in = params['b_in'].reshape(E, D)
    b_out = params['b_out'].reshape(E, D)
    bias_comp = jnp.concatenate([b_in @ wa_in, b_out @ wa_out], axis=0)          # (C, 3D)
    deg = adj4.sum(axis=3)                                                       # (B_pad, N, C)
    gate_bias = jnp.concatenate([params['b_r'], params['b_z'], params['b_t']], axis=1)  # (1, 3D)
    bias_const = (jnp.einsum('bnc,ck->bnk', deg, bias_comp)
                  + gate_bias[None]).reshape(B_pad * N, 3 * D)

    wt_h = w_t[2 * D:]                                                # (D, D)
    # pre-split output weight (no in-kernel value slices)
    w_o1_h = params['w_o1'][0:D]                                      # (D, HID)
    w_o1_a = params['w_o1'][D:]                                       # (A, HID)
    # fold final Linear + .sum(-1):  (o1 @ w_o2 + b_o2).sum(-1) == o1 @ w_o2.sum(1) + b_o2.sum()
    w_o2s = params['w_o2'].sum(axis=1).reshape(1, -1)                 # (1, HID)
    b_o2s = params['b_o2'].sum().reshape(1, 1)                        # (1, 1)
    return adj_bd, bias_const, c_cat, w_h_rz, wt_h, w_o1_h, w_o1_a, w_o2s, b_o2s


@functools.partial(jax.jit, static_argnames=("n_edge_type", "t_step", "block_batch"))
def ggnn_forward(prop_state, annotation, adj_mat, params, *,
                 n_edge_type, t_step, block_batch=None):
    B, N, D = prop_state.shape
    A = annotation.shape[-1]
    E = n_edge_type
    C = 2 * E

    # ---- batch blocking: fill MXU rows (~256) but keep >=2 programs for v7x's 2 TCs
    if block_batch is None:
        Bb = max(1, min(B, 256 // max(N, 1)))
        if B > 1:
            Bb = min(Bb, (B + 1) // 2)
    else:
        Bb = int(block_batch)
    num_blocks = pl.cdiv(B, Bb)
    B_pad = num_blocks * Bb
    BN = Bb * N

    if B_pad != B:
        pad = B_pad - B
        prop_state = jnp.pad(prop_state, ((0, pad), (0, 0), (0, 0)))
        annotation = jnp.pad(annotation, ((0, pad), (0, 0), (0, 0)))
        adj_mat = jnp.pad(adj_mat, ((0, pad), (0, 0), (0, 0)))

    (adj_bd, bias_const, c_cat, w_h_rz, wt_h,
     w_o1_h, w_o1_a, w_o2s, b_o2s) = _precompute(
        params, adj_mat, B_pad=B_pad, Bb=Bb, N=N, D=D, E=E)

    h0 = prop_state.reshape(B_pad * N, D).astype(jnp.float32)
    anno = annotation.reshape(B_pad * N, A).astype(jnp.float32)

    kernel = functools.partial(ggnn_kernel, BN=BN, D=D, C=C, T=t_step)

    def block_spec(rows, cols):                 # per-batch-block slabs
        return pl.BlockSpec((rows, cols), lambda k: (k, 0))

    def full_spec(shp):                         # weights resident across grid steps
        return pl.BlockSpec(shp, lambda k: (0,) * len(shp))

    grid_spec = pltpu.PrefetchScalarGridSpec(
        num_scalar_prefetch=0,
        grid=(num_blocks,),
        in_specs=[
            block_spec(BN, D),                  # h0
            block_spec(BN, A),                  # annotation
            block_spec(C * BN, BN),             # block-diagonal adjacency
            block_spec(BN, 3 * D),              # step-constant gate bias
            full_spec(c_cat.shape),             # composed gate weights (C*D, 3D)
            full_spec(w_h_rz.shape),            # (D, 3D)
            full_spec(wt_h.shape),              # (D, D)
            full_spec(w_o1_h.shape),            # (D, HID)
            full_spec(w_o1_a.shape),            # (A, HID)
            full_spec(params['b_o1'].shape),    # (1, HID)
            full_spec(w_o2s.shape),             # (1, HID)
            full_spec(b_o2s.shape),             # (1, 1)
        ],
        # lane-dense output: one (1, 1, BN) row slab per program
        out_specs=pl.BlockSpec((1, 1, BN), lambda k: (k, 0, 0)),
    )

    out = pl.pallas_call(
        kernel,
        out_shape=jax.ShapeDtypeStruct((num_blocks, 1, BN), jnp.float32),
        grid_spec=grid_spec,
        compiler_params=pltpu.CompilerParams(
            dimension_semantics=("parallel",)),   # shards batch blocks across v7x's 2 TCs
    )(h0, anno, adj_bd, bias_const, c_cat, w_h_rz, wt_h,
      w_o1_h, w_o1_a, params['b_o1'], w_o2s, b_o2s)

    return out.reshape(B_pad, N)[:B]


def init_params(key, *, D, A, E, hid, out_dim):
    """weight ~ N(0, 0.02), bias = 0  (matches GGNN._initialization)."""
    ks = jax.random.split(key, 7)
    std = 0.02
    f32 = jnp.float32
    return {
        'w_in':  std * jax.random.normal(ks[0], (E, D, D), f32),
        'b_in':  jnp.zeros((E, 1, D), f32),
        'w_out': std * jax.random.normal(ks[1], (E, D, D), f32),
        'b_out': jnp.zeros((E, 1, D), f32),
        'w_r':   std * jax.random.normal(ks[2], (3 * D, D), f32),
        'b_r':   jnp.zeros((1, D), f32),
        'w_z':   std * jax.random.normal(ks[3], (3 * D, D), f32),
        'b_z':   jnp.zeros((1, D), f32),
        'w_t':   std * jax.random.normal(ks[4], (3 * D, D), f32),
        'b_t':   jnp.zeros((1, D), f32),
        'w_o1':  std * jax.random.normal(ks[5], (D + A, hid), f32),
        'b_o1':  jnp.zeros((1, hid), f32),
        'w_o2':  std * jax.random.normal(ks[6], (hid, out_dim), f32),
        'b_o2':  jnp.zeros((1, out_dim), f32),
    }


def ggnn_reference(prop_state, annotation, adj_mat, p, *, n_edge_type, t_step):
    """Pure-JAX transcription of the PyTorch forward (for validation)."""
    B, N, D = prop_state.shape
    E = n_edge_type
    h = prop_state
    for _ in range(t_step):
        in_states = jnp.stack([h @ p['w_in'][e] + p['b_in'][e] for e in range(E)], axis=1)
        out_states = jnp.stack([h @ p['w_out'][e] + p['b_out'][e] for e in range(E)], axis=1)
        in_states = in_states.reshape(B, E * N, D)
        out_states = out_states.reshape(B, E * N, D)
        A_in = adj_mat[:, :, :N * E]
        A_out = adj_mat[:, :, N * E:]
        a_in = jnp.einsum('bne,bed->bnd', A_in, in_states)
        a_out = jnp.einsum('bne,bed->bnd', A_out, out_states)
        a = jnp.concatenate([a_in, a_out, h], axis=2)
        r = jax.nn.sigmoid(a @ p['w_r'] + p['b_r'])
        z = jax.nn.sigmoid(a @ p['w_z'] + p['b_z'])
        joint = jnp.concatenate([a_in, a_out, r * h], axis=2)
        h_hat = jnp.tanh(joint @ p['w_t'] + p['b_t'])
        h = (1.0 - z) * h + z * h_hat
    all_h = jnp.concatenate([h, annotation], axis=2)
    o1 = jax.nn.sigmoid(all_h @ p['w_o1'] + p['b_o1'])
    o2 = o1 @ p['w_o2'] + p['b_o2']
    return o2.sum(-1)


if __name__ == "__main__":
    # batch, n_node, state_dim, anno_dim, n_edge_type, t_step
    B, N, D, A, E, T = 8, 8, 32, 8, 2, 3
    HID, OUT = 16, 4                           # out_model hidden width, output_dim

    key = jax.random.PRNGKey(0)
    k1, k2, k3, k4 = jax.random.split(key, 4)
    prop_state = jax.random.normal(k1, (B, N, D), jnp.float32)
    annotation = jax.random.normal(k2, (B, N, A), jnp.float32)
    adj_mat = jax.random.bernoulli(k3, 0.3, (B, N, 2 * N * E)).astype(jnp.float32)
    params = init_params(k4, D=D, A=A, E=E, hid=HID, out_dim=OUT)

    out = ggnn_forward(prop_state, annotation, adj_mat, params,
                       n_edge_type=E, t_step=T)
    out = jax.block_until_ready(out)

    ref = ggnn_reference(prop_state, annotation, adj_mat, params,
                         n_edge_type=E, t_step=T)
    assert out.shape == (B, N)
    np.testing.assert_allclose(np.asarray(out), np.asarray(ref), rtol=1e-3, atol=1e-3)
    print("KERNEL_OK")
</pallas_src>

<mosaic_0001>
module attributes {stable_mosaic.version = 11 : i64} {
  func.func @ggnn_kernel(%arg0: i32, %arg1: memref<32x32xf32, #tpu.memory_space<vmem>>, %arg2: memref<32x8xf32, #tpu.memory_space<vmem>>, %arg3: memref<128x32xf32, #tpu.memory_space<vmem>>, %arg4: memref<32x96xf32, #tpu.memory_space<vmem>>, %arg5: memref<128x96xf32, #tpu.memory_space<vmem>>, %arg6: memref<32x96xf32, #tpu.memory_space<vmem>>, %arg7: memref<32x32xf32, #tpu.memory_space<vmem>>, %arg8: memref<32x16xf32, #tpu.memory_space<vmem>>, %arg9: memref<8x16xf32, #tpu.memory_space<vmem>>, %arg10: memref<1x16xf32, #tpu.memory_space<vmem>>, %arg11: memref<1x16xf32, #tpu.memory_space<vmem>>, %arg12: memref<1x1xf32, #tpu.memory_space<vmem>>, %arg13: memref<1x1x32xf32, #tpu.memory_space<vmem>>) attributes {dimension_semantics = [#tpu.dimension_semantics<parallel>], iteration_bounds = array<i64: 2>, scalar_prefetch = 0 : i64, scratch_operands = 0 : i64, tpu.core_type = #tpu.core_type<tc>, window_params = [{transform_indices = @transform_0, window_bounds = array<i64: 32, 32>}, {transform_indices = @transform_1, window_bounds = array<i64: 32, 8>}, {transform_indices = @transform_2, window_bounds = array<i64: 128, 32>}, {transform_indices = @transform_3, window_bounds = array<i64: 32, 96>}, {pipeline_mode = #tpu.pipeline_mode<synchronous>, transform_indices = @transform_4, window_bounds = array<i64: 128, 96>}, {pipeline_mode = #tpu.pipeline_mode<synchronous>, transform_indices = @transform_5, window_bounds = array<i64: 32, 96>}, {pipeline_mode = #tpu.pipeline_mode<synchronous>, transform_indices = @transform_6, window_bounds = array<i64: 32, 32>}, {pipeline_mode = #tpu.pipeline_mode<synchronous>, transform_indices = @transform_7, window_bounds = array<i64: 32, 16>}, {pipeline_mode = #tpu.pipeline_mode<synchronous>, transform_indices = @transform_8, window_bounds = array<i64: 8, 16>}, {pipeline_mode = #tpu.pipeline_mode<synchronous>, transform_indices = @transform_9, window_bounds = array<i64: 1, 16>}, {pipeline_mode = #tpu.pipeline_mode<synchronous>, transform_indices = @transform_10, window_bounds = array<i64: 1, 16>}, {pipeline_mode = #tpu.pipeline_mode<synchronous>, transform_indices = @transform_11, window_bounds = array<i64: 1, 1>}, {transform_indices = @transform_12, window_bounds = array<i64: 1, 1, 32>}]} {
    %c0 = arith.constant 0 : index
    %c0_0 = arith.constant 0 : index
    %0 = vector.load %arg1[%c0, %c0_0] : memref<32x32xf32, #tpu.memory_space<vmem>>, vector<32x32xf32>
    %c0_1 = arith.constant 0 : index
    %c0_2 = arith.constant 0 : index
    %1 = vector.load %arg3[%c0_1, %c0_2] : memref<128x32xf32, #tpu.memory_space<vmem>>, vector<128x32xf32>
    %c0_3 = arith.constant 0 : index
    %c0_4 = arith.constant 0 : index
    %2 = vector.load %arg4[%c0_3, %c0_4] : memref<32x96xf32, #tpu.memory_space<vmem>>, vector<32x96xf32>
    %c0_5 = arith.constant 0 : index
    %c0_6 = arith.constant 0 : index
    %3 = vector.load %arg6[%c0_5, %c0_6] : memref<32x96xf32, #tpu.memory_space<vmem>>, vector<32x96xf32>
    %c0_7 = arith.constant 0 : index
    %c0_8 = arith.constant 0 : index
    %4 = vector.load %arg7[%c0_7, %c0_8] : memref<32x32xf32, #tpu.memory_space<vmem>>, vector<32x32xf32>
    %c0_i32 = arith.constant 0 : i32
    %cst = arith.constant dense<0.000000e+00> : vector<128x32xf32>
    %5 = tpu.matmul %1, %0, %cst {dimension_numbers = #tpu.dot_dimension_numbers<[1], [0], [0], [1], [0, 0, 1, 1], [], []>} : vector<128x32xf32>, vector<32x32xf32>, vector<128x32xf32> -> vector<128x32xf32>
    %cst_9 = arith.constant dense<0.000000e+00> : vector<32x96xf32>
    %6 = tpu.matmul %0, %3, %cst_9 {dimension_numbers = #tpu.dot_dimension_numbers<[1], [0], [0], [1], [0, 0, 1, 1], [], []>} : vector<32x32xf32>, vector<32x96xf32>, vector<32x96xf32> -> vector<32x96xf32>
    %7 = arith.addf %6, %2 : vector<32x96xf32>
    %8 = vector.extract_strided_slice %5 {offsets = [0, 0], sizes = [32, 32], strides = [1, 1]} : vector<128x32xf32> to vector<32x32xf32>
    %c0_10 = arith.constant 0 : index
    %c0_11 = arith.constant 0 : index
    %9 = vector.load %arg5[%c0_10, %c0_11] : memref<128x96xf32, #tpu.memory_space<vmem>>, vector<32x96xf32>
    %cst_12 = arith.constant dense<0.000000e+00> : vector<32x96xf32>
    %10 = tpu.matmul %8, %9, %cst_12 {dimension_numbers = #tpu.dot_dimension_numbers<[1], [0], [0], [1], [0, 0, 1, 1], [], []>} : vector<32x32xf32>, vector<32x96xf32>, vector<32x96xf32> -> vector<32x96xf32>
    %11 = arith.addf %7, %10 : vector<32x96xf32>
    %12 = vector.extract_strided_slice %5 {offsets = [32, 0], sizes = [32, 32], strides = [1, 1]} : vector<128x32xf32> to vector<32x32xf32>
    %c32 = arith.constant 32 : index
    %c0_13 = arith.constant 0 : index
    %13 = vector.load %arg5[%c32, %c0_13] : memref<128x96xf32, #tpu.memory_space<vmem>>, vector<32x96xf32>
    %cst_14 = arith.constant dense<0.000000e+00> : vector<32x96xf32>
    %14 = tpu.matmul %12, %13, %cst_14 {dimension_numbers = #tpu.dot_dimension_numbers<[1], [0], [0], [1], [0, 0, 1, 1], [], []>} : vector<32x32xf32>, vector<32x96xf32>, vector<32x96xf32> -> vector<32x96xf32>
    %15 = arith.addf %11, %14 : vector<32x96xf32>
    %16 = vector.extract_strided_slice %5 {offsets = [64, 0], sizes = [32, 32], strides = [1, 1]} : vector<128x32xf32> to vector<32x32xf32>
    %c64 = arith.constant 64 : index
    %c0_15 = arith.constant 0 : index
    %17 = vector.load %arg5[%c64, %c0_15] : memref<128x96xf32, #tpu.memory_space<vmem>>, vector<32x96xf32>
    %cst_16 = arith.constant dense<0.000000e+00> : vector<32x96xf32>
    %18 = tpu.matmul %16, %17, %cst_16 {dimension_numbers = #tpu.dot_dimension_numbers<[1], [0], [0], [1], [0, 0, 1, 1], [], []>} : vector<32x32xf32>, vector<32x96xf32>, vector<32x96xf32> -> vector<32x96xf32>
    %19 = arith.addf %15, %18 : vector<32x96xf32>
    %20 = vector.extract_strided_slice %5 {offsets = [96, 0], sizes = [32, 32], strides = [1, 1]} : vector<128x32xf32> to vector<32x32xf32>
    %c96 = arith.constant 96 : index
    %c0_17 = arith.constant 0 : index
    %21 = vector.load %arg5[%c96, %c0_17] : memref<128x96xf32, #tpu.memory_space<vmem>>, vector<32x96xf32>
    %cst_18 = arith.constant dense<0.000000e+00> : vector<32x96xf32>
    %22 = tpu.matmul %20, %21, %cst_18 {dimension_numbers = #tpu.dot_dimension_numbers<[1], [0], [0], [1], [0, 0, 1, 1], [], []>} : vector<32x32xf32>, vector<32x96xf32>, vector<32x96xf32> -> vector<32x96xf32>
    %23 = arith.addf %19, %22 : vector<32x96xf32>
    %24 = vector.extract_strided_slice %23 {offsets = [0, 0], sizes = [32, 64], strides = [1, 1]} : vector<32x96xf32> to vector<32x64xf32>
    %25 = arith.negf %24 : vector<32x64xf32>
    %26 = math.exp %25 : vector<32x64xf32>
    %cst_19 = arith.constant 1.000000e+00 : f32
    %27 = vector.broadcast %cst_19 : f32 to vector<32x64xf32>
    %28 = arith.addf %27, %26 : vector<32x64xf32>
    %29 = arith.divf %27, %28 : vector<32x64xf32>
    %30 = vector.extract_strided_slice %29 {offsets = [0, 0], sizes = [32, 32], strides = [1, 1]} : vector<32x64xf32> to vector<32x32xf32>
    %31 = vector.extract_strided_slice %29 {offsets = [0, 32], sizes = [32, 32], strides = [1, 1]} : vector<32x64xf32> to vector<32x32xf32>
    %32 = vector.extract_strided_slice %23 {offsets = [0, 64], sizes = [32, 32], strides = [1, 1]} : vector<32x96xf32> to vector<32x32xf32>
    %33 = arith.mulf %30, %0 : vector<32x32xf32>
    %cst_20 = arith.constant dense<0.000000e+00> : vector<32x32xf32>
    %34 = tpu.matmul %33, %4, %cst_20 {dimension_numbers = #tpu.dot_dimension_numbers<[1], [0], [0], [1], [0, 0, 1, 1], [], []>} : vector<32x32xf32>, vector<32x32xf32>, vector<32x32xf32> -> vector<32x32xf32>
    %35 = arith.addf %32, %34 : vector<32x32xf32>
    %36 = math.tanh %35 : vector<32x32xf32>
    %37 = arith.subf %36, %0 : vector<32x32xf32>
    %38 = arith.mulf %31, %37 : vector<32x32xf32>
    %39 = arith.addf %0, %38 : vector<32x32xf32>
    %c1_i32 = arith.constant 1 : i32
    %cst_21 = arith.constant dense<0.000000e+00> : vector<128x32xf32>
    %40 = tpu.matmul %1, %39, %cst_21 {dimension_numbers = #tpu.dot_dimension_numbers<[1], [0], [0], [1], [0, 0, 1, 1], [], []>} : vector<128x32xf32>, vector<32x32xf32>, vector<128x32xf32> -> vector<128x32xf32>
    %cst_22 = arith.constant dense<0.000000e+00> : vector<32x96xf32>
    %41 = tpu.matmul %39, %3, %cst_22 {dimension_numbers = #tpu.dot_dimension_numbers<[1], [0], [0], [1], [0, 0, 1, 1], [], []>} : vector<32x32xf32>, vector<32x96xf32>, vector<32x96xf32> -> vector<32x96xf32>
    %42 = arith.addf %41, %2 : vector<32x96xf32>
    %43 = vector.extract_strided_slice %40 {offsets = [0, 0], sizes = [32, 32], strides = [1, 1]} : vector<128x32xf32> to vector<32x32xf32>
    %c0_23 = arith.constant 0 : index
    %c0_24 = arith.constant 0 : index
    %44 = vector.load %arg5[%c0_23, %c0_24] : memref<128x96xf32, #tpu.memory_space<vmem>>, vector<32x96xf32>
    %cst_25 = arith.constant dense<0.000000e+00> : vector<32x96xf32>
    %45 = tpu.matmul %43, %44, %cst_25 {dimension_numbers = #tpu.dot_dimension_numbers<[1], [0], [0], [1], [0, 0, 1, 1], [], []>} : vector<32x32xf32>, vector<32x96xf32>, vector<32x96xf32> -> vector<32x96xf32>
    %46 = arith.addf %42, %45 : vector<32x96xf32>
    %47 = vector.extract_strided_slice %40 {offsets = [32, 0], sizes = [32, 32], strides = [1, 1]} : vector<128x32xf32> to vector<32x32xf32>
    %c32_26 = arith.constant 32 : index
    %c0_27 = arith.constant 0 : index
    %48 = vector.load %arg5[%c32_26, %c0_27] : memref<128x96xf32, #tpu.memory_space<vmem>>, vector<32x96xf32>
    %cst_28 = arith.constant dense<0.000000e+00> : vector<32x96xf32>
    %49 = tpu.matmul %47, %48, %cst_28 {dimension_numbers = #tpu.dot_dimension_numbers<[1], [0], [0], [1], [0, 0, 1, 1], [], []>} : vector<32x32xf32>, vector<32x96xf32>, vector<32x96xf32> -> vector<32x96xf32>
    %50 = arith.addf %46, %49 : vector<32x96xf32>
    %51 = vector.extract_strided_slice %40 {offsets = [64, 0], sizes = [32, 32], strides = [1, 1]} : vector<128x32xf32> to vector<32x32xf32>
    %c64_29 = arith.constant 64 : index
    %c0_30 = arith.constant 0 : index
    %52 = vector.load %arg5[%c64_29, %c0_30] : memref<128x96xf32, #tpu.memory_space<vmem>>, vector<32x96xf32>
    %cst_31 = arith.constant dense<0.000000e+00> : vector<32x96xf32>
    %53 = tpu.matmul %51, %52, %cst_31 {dimension_numbers = #tpu.dot_dimension_numbers<[1], [0], [0], [1], [0, 0, 1, 1], [], []>} : vector<32x32xf32>, vector<32x96xf32>, vector<32x96xf32> -> vector<32x96xf32>
    %54 = arith.addf %50, %53 : vector<32x96xf32>
    %55 = vector.extract_strided_slice %40 {offsets = [96, 0], sizes = [32, 32], strides = [1, 1]} : vector<128x32xf32> to vector<32x32xf32>
    %c96_32 = arith.constant 96 : index
    %c0_33 = arith.constant 0 : index
    %56 = vector.load %arg5[%c96_32, %c0_33] : memref<128x96xf32, #tpu.memory_space<vmem>>, vector<32x96xf32>
    %cst_34 = arith.constant dense<0.000000e+00> : vector<32x96xf32>
    %57 = tpu.matmul %55, %56, %cst_34 {dimension_numbers = #tpu.dot_dimension_numbers<[1], [0], [0], [1], [0, 0, 1, 1], [], []>} : vector<32x32xf32>, vector<32x96xf32>, vector<32x96xf32> -> vector<32x96xf32>
    %58 = arith.addf %54, %57 : vector<32x96xf32>
    %59 = vector.extract_strided_slice %58 {offsets = [0, 0], sizes = [32, 64], strides = [1, 1]} : vector<32x96xf32> to vector<32x64xf32>
    %60 = arith.negf %59 : vector<32x64xf32>
    %61 = math.exp %60 : vector<32x64xf32>
    %cst_35 = arith.constant 1.000000e+00 : f32
    %62 = vector.broadcast %cst_35 : f32 to vector<32x64xf32>
    %63 = arith.addf %62, %61 : vector<32x64xf32>
    %64 = arith.divf %62, %63 : vector<32x64xf32>
    %65 = vector.extract_strided_slice %64 {offsets = [0, 0], sizes = [32, 32], strides = [1, 1]} : vector<32x64xf32> to vector<32x32xf32>
    %66 = vector.extract_strided_slice %64 {offsets = [0, 32], sizes = [32, 32], strides = [1, 1]} : vector<32x64xf32> to vector<32x32xf32>
    %67 = vector.extract_strided_slice %58 {offsets = [0, 64], sizes = [32, 32], strides = [1, 1]} : vector<32x96xf32> to vector<32x32xf32>
    %68 = arith.mulf %65, %39 : vector<32x32xf32>
    %cst_36 = arith.constant dense<0.000000e+00> : vector<32x32xf32>
    %69 = tpu.matmul %68, %4, %cst_36 {dimension_numbers = #tpu.dot_dimension_numbers<[1], [0], [0], [1], [0, 0, 1, 1], [], []>} : vector<32x32xf32>, vector<32x32xf32>, vector<32x32xf32> -> vector<32x32xf32>
    %70 = arith.addf %67, %69 : vector<32x32xf32>
    %71 = math.tanh %70 : vector<32x32xf32>
    %72 = arith.subf %71, %39 : vector<32x32xf32>
    %73 = arith.mulf %66, %72 : vector<32x32xf32>
    %74 = arith.addf %39, %73 : vector<32x32xf32>
    %c2_i32 = arith.constant 2 : i32
    %cst_37 = arith.constant dense<0.000000e+00> : vector<128x32xf32>
    %75 = tpu.matmul %1, %74, %cst_37 {dimension_numbers = #tpu.dot_dimension_numbers<[1], [0], [0], [1], [0, 0, 1, 1], [], []>} : vector<128x32xf32>, vector<32x32xf32>, vector<128x32xf32> -> vector<128x32xf32>
    %cst_38 = arith.constant dense<0.000000e+00> : vector<32x96xf32>
    %76 = tpu.matmul %74, %3, %cst_38 {dimension_numbers = #tpu.dot_dimension_numbers<[1], [0], [0], [1], [0, 0, 1, 1], [], []>} : vector<32x32xf32>, vector<32x96xf32>, vector<32x96xf32> -> vector<32x96xf32>
    %77 = arith.addf %76, %2 : vector<32x96xf32>
    %78 = vector.extract_strided_slice %75 {offsets = [0, 0], sizes = [32, 32], strides = [1, 1]} : vector<128x32xf32> to vector<32x32xf32>
    %c0_39 = arith.constant 0 : index
    %c0_40 = arith.constant 0 : index
    %79 = vector.load %arg5[%c0_39, %c0_40] : memref<128x96xf32, #tpu.memory_space<vmem>>, vector<32x96xf32>
    %cst_41 = arith.constant dense<0.000000e+00> : vector<32x96xf32>
    %80 = tpu.matmul %78, %79, %cst_41 {dimension_numbers = #tpu.dot_dimension_numbers<[1], [0], [0], [1], [0, 0, 1, 1], [], []>} : vector<32x32xf32>, vector<32x96xf32>, vector<32x96xf32> -> vector<32x96xf32>
    %81 = arith.addf %77, %80 : vector<32x96xf32>
    %82 = vector.extract_strided_slice %75 {offsets = [32, 0], sizes = [32, 32], strides = [1, 1]} : vector<128x32xf32> to vector<32x32xf32>
    %c32_42 = arith.constant 32 : index
    %c0_43 = arith.constant 0 : index
    %83 = vector.load %arg5[%c32_42, %c0_43] : memref<128x96xf32, #tpu.memory_space<vmem>>, vector<32x96xf32>
    %cst_44 = arith.constant dense<0.000000e+00> : vector<32x96xf32>
    %84 = tpu.matmul %82, %83, %cst_44 {dimension_numbers = #tpu.dot_dimension_numbers<[1], [0], [0], [1], [0, 0, 1, 1], [], []>} : vector<32x32xf32>, vector<32x96xf32>, vector<32x96xf32> -> vector<32x96xf32>
    %85 = arith.addf %81, %84 : vector<32x96xf32>
    %86 = vector.extract_strided_slice %75 {offsets = [64, 0], sizes = [32, 32], strides = [1, 1]} : vector<128x32xf32> to vector<32x32xf32>
    %c64_45 = arith.constant 64 : index
    %c0_46 = arith.constant 0 : index
    %87 = vector.load %arg5[%c64_45, %c0_46] : memref<128x96xf32, #tpu.memory_space<vmem>>, vector<32x96xf32>
    %cst_47 = arith.constant dense<0.000000e+00> : vector<32x96xf32>
    %88 = tpu.matmul %86, %87, %cst_47 {dimension_numbers = #tpu.dot_dimension_numbers<[1], [0], [0], [1], [0, 0, 1, 1], [], []>} : vector<32x32xf32>, vector<32x96xf32>, vector<32x96xf32> -> vector<32x96xf32>
    %89 = arith.addf %85, %88 : vector<32x96xf32>
    %90 = vector.extract_strided_slice %75 {offsets = [96, 0], sizes = [32, 32], strides = [1, 1]} : vector<128x32xf32> to vector<32x32xf32>
    %c96_48 = arith.constant 96 : index
    %c0_49 = arith.constant 0 : index
    %91 = vector.load %arg5[%c96_48, %c0_49] : memref<128x96xf32, #tpu.memory_space<vmem>>, vector<32x96xf32>
    %cst_50 = arith.constant dense<0.000000e+00> : vector<32x96xf32>
    %92 = tpu.matmul %90, %91, %cst_50 {dimension_numbers = #tpu.dot_dimension_numbers<[1], [0], [0], [1], [0, 0, 1, 1], [], []>} : vector<32x32xf32>, vector<32x96xf32>, vector<32x96xf32> -> vector<32x96xf32>
    %93 = arith.addf %89, %92 : vector<32x96xf32>
    %94 = vector.extract_strided_slice %93 {offsets = [0, 0], sizes = [32, 64], strides = [1, 1]} : vector<32x96xf32> to vector<32x64xf32>
    %95 = arith.negf %94 : vector<32x64xf32>
    %96 = math.exp %95 : vector<32x64xf32>
    %cst_51 = arith.constant 1.000000e+00 : f32
    %97 = vector.broadcast %cst_51 : f32 to vector<32x64xf32>
    %98 = arith.addf %97, %96 : vector<32x64xf32>
    %99 = arith.divf %97, %98 : vector<32x64xf32>
    %100 = vector.extract_strided_slice %99 {offsets = [0, 0], sizes = [32, 32], strides = [1, 1]} : vector<32x64xf32> to vector<32x32xf32>
    %101 = vector.extract_strided_slice %99 {offsets = [0, 32], sizes = [32, 32], strides = [1, 1]} : vector<32x64xf32> to vector<32x32xf32>
    %102 = vector.extract_strided_slice %93 {offsets = [0, 64], sizes = [32, 32], strides = [1, 1]} : vector<32x96xf32> to vector<32x32xf32>
    %103 = arith.mulf %100, %74 : vector<32x32xf32>
    %cst_52 = arith.constant dense<0.000000e+00> : vector<32x32xf32>
    %104 = tpu.matmul %103, %4, %cst_52 {dimension_numbers = #tpu.dot_dimension_numbers<[1], [0], [0], [1], [0, 0, 1, 1], [], []>} : vector<32x32xf32>, vector<32x32xf32>, vector<32x32xf32> -> vector<32x32xf32>
    %105 = arith.addf %102, %104 : vector<32x32xf32>
    %106 = math.tanh %105 : vector<32x32xf32>
    %107 = arith.subf %106, %74 : vector<32x32xf32>
    %108 = arith.mulf %101, %107 : vector<32x32xf32>
    %109 = arith.addf %74, %108 : vector<32x32xf32>
    %c0_53 = arith.constant 0 : index
    %c0_54 = arith.constant 0 : index
    %110 = vector.load %arg8[%c0_53, %c0_54] : memref<32x16xf32, #tpu.memory_space<vmem>>, vector<32x16xf32>
    %cst_55 = arith.constant dense<0.000000e+00> : vector<32x16xf32>
    %111 = tpu.matmul %109, %110, %cst_55 {dimension_numbers = #tpu.dot_dimension_numbers<[1], [0], [0], [1], [0, 0, 1, 1], [], []>} : vector<32x32xf32>, vector<32x16xf32>, vector<32x16xf32> -> vector<32x16xf32>
    %c0_56 = arith.constant 0 : index
    %c0_57 = arith.constant 0 : index
    %112 = vector.load %arg2[%c0_56, %c0_57] : memref<32x8xf32, #tpu.memory_space<vmem>>, vector<32x8xf32>
    %c0_58 = arith.constant 0 : index
    %c0_59 = arith.constant 0 : index
    %113 = vector.load %arg9[%c0_58, %c0_59] : memref<8x16xf32, #tpu.memory_space<vmem>>, vector<8x16xf32>
    %cst_60 = arith.constant dense<0.000000e+00> : vector<32x16xf32>
    %114 = tpu.matmul %112, %113, %cst_60 {dimension_numbers = #tpu.dot_dimension_numbers<[1], [0], [0], [1], [0, 0, 1, 1], [], []>} : vector<32x8xf32>, vector<8x16xf32>, vector<32x16xf32> -> vector<32x16xf32>
    %115 = arith.addf %111, %114 : vector<32x16xf32>
    %c0_61 = arith.constant 0 : index
    %c0_62 = arith.constant 0 : index
    %116 = vector.load %arg10[%c0_61, %c0_62] : memref<1x16xf32, #tpu.memory_space<vmem>>, vector<1x16xf32>
    %117 = vector.broadcast %116 : vector<1x16xf32> to vector<32x16xf32>
    %118 = arith.addf %115, %117 : vector<32x16xf32>
    %119 = arith.negf %118 : vector<32x16xf32>
    %120 = math.exp %119 : vector<32x16xf32>
    %cst_63 = arith.constant 1.000000e+00 : f32
    %121 = vector.broadcast %cst_63 : f32 to vector<32x16xf32>
    %122 = arith.addf %121, %120 : vector<32x16xf32>
    %123 = arith.divf %121, %122 : vector<32x16xf32>
    %c0_64 = arith.constant 0 : index
    %c0_65 = arith.constant 0 : index
    %124 = vector.load %arg11[%c0_64, %c0_65] : memref<1x16xf32, #tpu.memory_space<vmem>>, vector<1x16xf32>
    %cst_66 = arith.constant dense<0.000000e+00> : vector<1x32xf32>
    %125 = tpu.matmul %124, %123, %cst_66 {dimension_numbers = #tpu.dot_dimension_numbers<[1], [1], [0], [0], [0, 0, 1, 0], [], []>} : vector<1x16xf32>, vector<32x16xf32>, vector<1x32xf32> -> vector<1x32xf32>
    %c0_67 = arith.constant 0 : index
    %c0_68 = arith.constant 0 : index
    %126 = vector.load %arg12[%c0_67, %c0_68] : memref<1x1xf32, #tpu.memory_space<vmem>>, vector<1x1xf32>
    %127 = vector.broadcast %126 : vector<1x1xf32> to vector<1x32xf32>
    %128 = arith.addf %125, %127 : vector<1x32xf32>
    %129 = vector.shape_cast %128 : vector<1x32xf32> to vector<1x1x32xf32>
    %c0_69 = arith.constant 0 : index
    %c0_70 = arith.constant 0 : index
    %c0_71 = arith.constant 0 : index
    %130 = vector.load %arg13[%c0_69, %c0_70, %c0_71] : memref<1x1x32xf32, #tpu.memory_space<vmem>>, vector<1x1x32xf32>
    tpu.vector_store %arg13[%c0_69, %c0_70, %c0_71], %129 {strides = array<i32>} : memref<1x1x32xf32, #tpu.memory_space<vmem>>, vector<1x1x32xf32>,
    return
  }
  func.func @transform_0(%arg0: i32) -> (i32, i32) {
    %c0_i32 = arith.constant 0 : i32
    %c0_i32_0 = arith.constant 0 : i32
    return %arg0, %c0_i32 : i32, i32
  }
  func.func @transform_1(%arg0: i32) -> (i32, i32) {
    %c0_i32 = arith.constant 0 : i32
    %c0_i32_0 = arith.constant 0 : i32
    return %arg0, %c0_i32 : i32, i32
  }
  func.func @transform_2(%arg0: i32) -> (i32, i32) {
    %c0_i32 = arith.constant 0 : i32
    %c0_i32_0 = arith.constant 0 : i32
    return %arg0, %c0_i32 : i32, i32
  }
  func.func @transform_3(%arg0: i32) -> (i32, i32) {
    %c0_i32 = arith.constant 0 : i32
    %c0_i32_0 = arith.constant 0 : i32
    return %arg0, %c0_i32 : i32, i32
  }
  func.func @transform_4(%arg0: i32) -> (i32, i32) {
    %c0_i32 = arith.constant 0 : i32
    %c0_i32_0 = arith.constant 0 : i32
    %c0_i32_1 = arith.constant 0 : i32
    return %c0_i32, %c0_i32_0 : i32, i32
  }
  func.func @transform_5(%arg0: i32) -> (i32, i32) {
    %c0_i32 = arith.constant 0 : i32
    %c0_i32_0 = arith.constant 0 : i32
    %c0_i32_1 = arith.constant 0 : i32
    return %c0_i32, %c0_i32_0 : i32, i32
  }
  func.func @transform_6(%arg0: i32) -> (i32, i32) {
    %c0_i32 = arith.constant 0 : i32
    %c0_i32_0 = arith.constant 0 : i32
    %c0_i32_1 = arith.constant 0 : i32
    return %c0_i32, %c0_i32_0 : i32, i32
  }
  func.func @transform_7(%arg0: i32) -> (i32, i32) {
    %c0_i32 = arith.constant 0 : i32
    %c0_i32_0 = arith.constant 0 : i32
    %c0_i32_1 = arith.constant 0 : i32
    return %c0_i32, %c0_i32_0 : i32, i32
  }
  func.func @transform_8(%arg0: i32) -> (i32, i32) {
    %c0_i32 = arith.constant 0 : i32
    %c0_i32_0 = arith.constant 0 : i32
    %c0_i32_1 = arith.constant 0 : i32
    return %c0_i32, %c0_i32_0 : i32, i32
  }
  func.func @transform_9(%arg0: i32) -> (i32, i32) {
    %c0_i32 = arith.constant 0 : i32
    %c0_i32_0 = arith.constant 0 : i32
    %c0_i32_1 = arith.constant 0 : i32
    return %c0_i32, %c0_i32_0 : i32, i32
  }
  func.func @transform_10(%arg0: i32) -> (i32, i32) {
    %c0_i32 = arith.constant 0 : i32
    %c0_i32_0 = arith.constant 0 : i32
    %c0_i32_1 = arith.constant 0 : i32
    return %c0_i32, %c0_i32_0 : i32, i32
  }
  func.func @transform_11(%arg0: i32) -> (i32, i32) {
    %c0_i32 = arith.constant 0 : i32
    %c0_i32_0 = arith.constant 0 : i32
    %c0_i32_1 = arith.constant 0 : i32
    return %c0_i32, %c0_i32_0 : i32, i32
  }
  func.func @transform_12(%arg0: i32) -> (i32, i32, i32) {
    %c0_i32 = arith.constant 0 : i32
    %c0_i32_0 = arith.constant 0 : i32
    %c0_i32_1 = arith.constant 0 : i32
    return %arg0, %c0_i32, %c0_i32_0 : i32, i32, i32
  }
}

</mosaic_0001>

<bundles_post_ra>
// kernel: ggnn_forward.1
= control target key start
LH: loop header
LB: loop body
LE: loop exit
PB: predicated region body
PF: predicated region fallthrough
CT: control target
= control target key end

     0   :  { %s4752_s23 = smov 0   ;;  %s5378_s0 = inlined_call_operand.vmem [shape: f32[64,32], index: 0, kind: input, shape index: {}]   ;;  %s5379_s1 = inlined_call_operand.vmem [shape: f32[64,8], index: 1, kind: input, shape index: {}]   ;;  %s5380_s2 = inlined_call_operand.vmem [shape: f32[256,32], index: 2, kind: input, shape index: {}]   ;;  %s5381_s3 = inlined_call_operand.vmem [shape: f32[64,96], index: 3, kind: input, shape index: {}]   ;;  %s5382_s4 = inlined_call_operand.vmem [shape: f32[128,96], index: 4, kind: input, shape index: {}]   ;;  %s5383_s5 = inlined_call_operand.vmem [shape: f32[32,96], index: 5, kind: input, shape index: {}]   ;;  %s5384_s6 = inlined_call_operand.vmem [shape: f32[32,32], index: 6, kind: input, shape index: {}]   ;;  %s5385_s7 = inlined_call_operand.vmem [shape: f32[32,16], index: 7, kind: input, shape index: {}]   ;;  %s5386_s8 = inlined_call_operand.vmem [shape: f32[8,16], index: 8, kind: input, shape index: {}]   ;;  %s5387_s9 = inlined_call_operand.vmem [shape: f32[1,16], index: 9, kind: input, shape index: {}]   ;;  %s5388_s10 = inlined_call_operand.vmem [shape: f32[1,16], index: 10, kind: input, shape index: {}]   ;;  %s5389_s11 = inlined_call_operand.<no memory space> [shape: f32[1,1], index: 11, kind: input, shape index: {}]   ;;  %s5390_s12 = inlined_call_operand.vmem [shape: f32[2,1,32], index: 12, kind: output, shape index: {}]  }
   0x1   :  { %v17_v0 = vstv %s5389_s11 }
   0x2   :  { %18 = vst [vmem:[#allocation2] sm:$0x1] %v17_v0 }
   0x3 LB: > { %s4758_s24 = sadd.s32 4294967295, %s4676_s23   ;;  %p3555_p0 = scmp.ge.s32.totalorder %s4676_s23, 1  ;;  %s4676_s23 = sphi %s4752_s23, %s24_s23  }
   0x4   : > { %p398_p1 = scmp.lt.s32.totalorder %s4676_s23, 3 }
   0x6   : > { %p399_p2 = pnand %p3555_p0, %p398_p1 }
   0x7   : > { %s3556_s11 = sshll.u32 (!%p399_p2), %s4758_s24, 2  ;;  %s3560_s25 = sshll.u32 (!%p399_p2), %s4758_s24, 4  ;;  %v504_v1 = vld [vmem:[%s5383_s5] sm:$0xff] (!%p399_p2)  ;;  %v505_v2 = vld [vmem:[%s5383_s5 + $0x8] sm:$0xff] (!%p399_p2)  ;;  %v506_v3 = vld [vmem:[%s5383_s5 + $0x10] sm:$0xff] (!%p399_p2)  ;;  %vm512_vm0 = vcmask (!%p399_p2), 261120  }
   0x8   : > { %402 = sbr.rel (%p399_p2) target bundleno = 3704 (0xe78), region = 68  ;;  %p454_p3 = scmp.lt.s32.totalorder (!%p399_p2), %s3556_s11, 7  ;;  %v4773_v4 = vpack.c.bf16 (!%p399_p2), %v505_v2, %v504_v1  ;;  %v507_v5 = vld [vmem:[%s5383_s5 + $0x18] sm:$0xff] (!%p399_p2)  ;;  %v803_v7 = vld [vmem:[%s5382_s4] sm:$0xff] (!%p399_p2)  ;;  %v804_v8 = vld [vmem:[%s5382_s4 + $0x8] sm:$0xff] (!%p399_p2)  ;;  %vm3139_vm1 = vcmask (!%p399_p2), 64512  }
   0x9   : > { %p466_p4 = scmp.lt.s32.totalorder (!%p399_p2), %s3560_s25, 31  ;;  %v4778_v6 = vpack.c.bf16 (!%p399_p2), %v507_v5, %v506_v3  ;;  %v4791_v9 = vpack.c.bf16 (!%p399_p2), %v804_v8, %v803_v7  ;;  %v805_v10 = vld [vmem:[%s5382_s4 + $0x10] sm:$0xff] (!%p399_p2)  ;;  %v806_v11 = vld [vmem:[%s5382_s4 + $0x18] sm:$0xff] (!%p399_p2)  ;;  %v908_v35 = vld [vmem:[%s5382_s4 + $0x20] sm:$0xff] (!%p399_p2)  ;;  %s4678_s18 = smov (!%p399_p2), 64   ;;  %vm4681_vm2 = vmmov (!%p399_p2), 0  }
   0xa   : > { %4328 = vmatprep.subr.bf16.mxu1 (!%p399_p2), %v4773_v4  ;;  %v4829_v19 = vpack.c.bf16 (!%p399_p2), %v806_v11, %v805_v10  ;;  %v909_v36 = vld [vmem:[%s5382_s4 + $0x28] sm:$0xff] (!%p399_p2)  ;;  %v910_v38 = vld [vmem:[%s5382_s4 + $0x30] sm:$0xff] (!%p399_p2)  ;;  %v911_v39 = vld [vmem:[%s5382_s4 + $0x38] sm:$0xff] (!%p399_p2)  ;;  %s4679_s19 = smov (!%p399_p2), 96   ;;  %vm3380_vm3 = vcmask (!%p399_p2), 130048   ;;  %p477_p5 = scmp.lt.s32.totalorder (!%p399_p2), %s4758_s24, 1 }
   0xb   : > { %4330 = vmatpush3.bf16.msra.mxu1 (!%p399_p2), %v4773_v4  ;;  %v4921_v37 = vpack.c.bf16 (!%p399_p2), %v909_v36, %v908_v35  ;;  %v4930_v42 = vpack.c.bf16 (!%p399_p2), %v911_v39, %v910_v38  ;;  %v1013_v43 = vld [vmem:[%s5382_s4 + $0x40] sm:$0xff] (!%p399_p2)  ;;  %v1014_v44 = vld [vmem:[%s5382_s4 + $0x48] sm:$0xff] (!%p399_p2)  ;;  %v1015_v48 = vld [vmem:[%s5382_s4 + $0x50] sm:$0xff] (!%p399_p2)  ;;  %vm3466_vm5 = vcmask (!%p399_p2), 253952  }
   0xc   : > { %4332 = vmatprep.subr.bf16.mxu1 (!%p399_p2), %v4778_v6  ;;  %v4942_v47 = vpack.c.bf16 (!%p399_p2), %v1014_v44, %v1013_v43  ;;  %v1016_v49 = vld [vmem:[%s5382_s4 + $0x58] sm:$0xff] (!%p399_p2)  ;;  %v1118_v53 = vld [vmem:[%s5382_s4 + $0x60] sm:$0xff] (!%p399_p2)  ;;  %v1119_v54 = vld [vmem:[%s5382_s4 + $0x68] sm:$0xff] (!%p399_p2) }
   0xd   : > { %v4954_v52 = vpack.c.bf16 (!%p399_p2), %v1016_v49, %v1015_v48  ;;  %v4966_v57 = vpack.c.bf16 (!%p399_p2), %v1119_v54, %v1118_v53  ;;  %v1120_v58 = vld [vmem:[%s5382_s4 + $0x70] sm:$0xff] (!%p399_p2)  ;;  %v1121_v59 = vld [vmem:[%s5382_s4 + $0x78] sm:$0xff] (!%p399_p2)  ;;  %v508_v7 = vld [vmem:[%s5384_s6] sm:$0xff] (!%p399_p2) }
   0xe   : > { %v4978_v62 = vpack.c.bf16 (!%p399_p2), %v1121_v59, %v1120_v58  ;;  %v509_v8 = vld [vmem:[%s5384_s6 + $0x8] sm:$0xff] (!%p399_p2)  ;;  %v510_v11 = vld [vmem:[%s5384_s6 + $0x10] sm:$0xff] (!%p399_p2)  ;;  %vm4497_vm4 = vmpackc.low (!%p399_p2), %vm3380_vm3, %vm3380_vm3 }
   0xf   : > { %s5392_s11 = smov (!%p454_p3, %s3556_s11), 7  ;;  %s5394_s25 = smov (!%p466_p4, %s3560_s25), 31  ;;  %4334 = vmatpush3.bf16.msra.mxu1 %v4778_v6  ;;  %v5002_v10 = vpack.c.bf16 %v509_v8, %v508_v7 }
  0x10   : > { %s4788_s20 = sshll.u32 %s5392_s11, 3  ;;  %s3561_s27 = sshll.u32 %s5394_s25, 3  ;;  %4336 = vmatprep.subr.bf16.mxu1 %v4791_v9 }
  0x11   : > { %s457_s26 = scalar_lea.vmem %s5378_s0, %s4788_s20  ;;  %s4812_s15 = scalar_lea.vmem %s5380_s2, %s3561_s27 }
  0x12   : > { %v4803_v12 = vld [vmem:[%s457_s26] sm:$0xff]  ;;  %v4805_v13 = vld [vmem:[%s457_s26 + $0x8] sm:$0xff]  ;;  %v4807_v14 = vld [vmem:[%s457_s26 + $0x10] sm:$0xff]  ;;  %s475_s17 = scalar_lea.vmem %s5381_s3, %s4788_s20  ;;  %s5322_s28 = scalar_lea.vmem %s5379_s1, %s4788_s20 }
  0x13   : > { %v4319_v15 = vpack.c.bf16 %v4805_v13, %v4803_v12  ;;  %v4816_v16 = vld [vmem:[%s457_s26 + $0x18] sm:$0xff]  ;;  %v4819_v17 = vld [vmem:[%s4812_s15] sm:$0xff]  ;;  %3978 = vmatprep.mubr.msk.f32.mxu1 %vm512_vm0, %v4803_v12  ;;  %v4838_v20 = vld [vmem:[%s4812_s15 + $0x8] sm:$0xff]  ;;  %s5396_s24 = smov (!%p477_p5, %s4758_s24), 1 }
  0x14   : > { %v4323_v18 = vpack.c.bf16 %v4816_v16, %v4807_v14  ;;  %3946 = vmatprep.mubr.msk.f32.mxu0 %vm512_vm0, %v4819_v17  ;;  %3979 = vmatmul.mubr.msk.f32.vlgmr.msra.gmra.mrb[0].mxu1 %vm512_vm0, %v4805_v13  ;;  %v4843_v21 = vld [vmem:[%s4812_s15 + $0x10] sm:$0xff]  ;;  %v4851_v22 = vld [vmem:[%s4812_s15 + $0x18] sm:$0xff]  ;;  %v4854_v23 = vld [vmem:[%s4812_s15 + $0x20] sm:$0xff]  ;;  %s479_s26 = scalar_lea.vmem %s5390_s12, %s5396_s24 }
  0x15   : > { %4320 = vmatprep.subr.bf16.mxu0 %v4319_v15  ;;  %4338 = vmatpush3.bf16.msra.mxu1 %v4791_v9  ;;  %v4861_v24 = vld [vmem:[%s4812_s15 + $0x28] sm:$0xff]  ;;  %v4864_v25 = vld [vmem:[%s4812_s15 + $0x30] sm:$0xff]  ;;  %v4871_v26 = vld [vmem:[%s4812_s15 + $0x38] sm:$0xff] }
  0x16   : > { %4322 = vmatpush3.bf16.msra.mxu0 %v4319_v15  ;;  %3981 = vmatprep.mubr.msk.f32.mxu1 %vm512_vm0, %v4807_v14  ;;  %v4874_v27 = vld [vmem:[%s4812_s15 + $0x40] sm:$0xff]  ;;  %v4881_v28 = vld [vmem:[%s4812_s15 + $0x48] sm:$0xff]  ;;  %v4884_v29 = vld [vmem:[%s4812_s15 + $0x50] sm:$0xff] }
  0x17   : > { %4324 = vmatprep.subr.bf16.mxu0 %v4323_v18  ;;  %4340 = vmatprep.subr.bf16.mxu1 %v4829_v19  ;;  %v4891_v30 = vld [vmem:[%s4812_s15 + $0x58] sm:$0xff]  ;;  %v4894_v31 = vld [vmem:[%s4812_s15 + $0x60] sm:$0xff]  ;;  %v4901_v32 = vld [vmem:[%s4812_s15 + $0x68] sm:$0xff] }
  0x18   : > { %3982 = vmatmul.mubr.msk.f32.gmra.mrb[2].mxu1 %vm512_vm0, %v4816_v16  ;;  %v4904_v33 = vld [vmem:[%s4812_s15 + $0x70] sm:$0xff]  ;;  %v4911_v34 = vld [vmem:[%s4812_s15 + $0x78] sm:$0xff]  ;;  %v5020_v35 = vld [vmem:[%s475_s17 + $0x8] sm:$0xff] }
  0x19   : > { %4342 = vmatpush3.bf16.msra.mxu1 %v4829_v19  ;;  %v511_v15 = vld [vmem:[%s5384_s6 + $0x18] sm:$0xff]  ;;  %v5022_v36 = vld [vmem:[%s475_s17] sm:$0xff] }
  0x1a   : > { %4326 = vmatpush3.bf16.msra.mxu0 %v4323_v18  ;;  %4344 = vmatprep.subr.bf16.mxu1 %v4921_v37  ;;  %v5012_v18 = vpack.c.bf16 %v511_v15, %v510_v11  ;;  %v5026_v43 = vld [vmem:[%s475_s17 + $0x18] sm:$0xff] }
  0x1b   : > { %4368 = vmatprep.subr.bf16.mxu0 %v5002_v10 }
  0x1d   : > { %3947 = vmatmul.mubr.msk.f32.vlgmr.msra.gmra.mrb[0].mxu0 %vm512_vm0, %v4838_v20 }
  0x1e   : > { %3949 = vmatprep.mubr.msk.f32.mxu0 %vm512_vm0, %v4843_v21  ;;  %4370 = vmatpush3.bf16.msra.mxu0 %v5002_v10 }
  0x1f   : > { %4372 = vmatprep.subr.bf16.mxu0 %v5012_v18 }
  0x21   : > { %3950 = vmatmul.mubr.msk.f32.gmra.mrb[2].mxu0 %vm512_vm0, %v4851_v22 }
  0x22   : > { %3952 = vmatprep.mubr.msk.f32.mxu0 %vm512_vm0, %v4854_v23  ;;  %4374 = vmatpush3.bf16.msra.mxu0 %v5012_v18 }
  0x25   : > { %3953 = vmatmul.mubr.msk.f32.gmra.mrb[4].mxu0 %vm512_vm0, %v4861_v24 }
  0x26   : > { %3955 = vmatprep.mubr.msk.f32.mxu0 %vm512_vm0, %v4864_v25 }
  0x29   : > { %3956 = vmatmul.mubr.msk.f32.gmra.mrb[6].mxu0 %vm512_vm0, %v4871_v26 }
  0x2a   : > { %3958 = vmatprep.mubr.msk.f32.mxu0 %vm512_vm0, %v4874_v27 }
  0x2d   : > { %3959 = vmatmul.mubr.msk.f32.gmra.mrb[8].mxu0 %vm512_vm0, %v4881_v28 }
  0x2e   : > { %3961 = vmatprep.mubr.msk.f32.mxu0 %vm512_vm0, %v4884_v29 }
  0x31   : > { %3962 = vmatmul.mubr.msk.f32.gmra.mrb[10].mxu0 %vm512_vm0, %v4891_v30 }
  0x32   : > { %3964 = vmatprep.mubr.msk.f32.mxu0 %vm512_vm0, %v4894_v31 }
  0x35   : > { %3965 = vmatmul.mubr.msk.f32.gmra.mrb[12].mxu0 %vm512_vm0, %v4901_v32 }
  0x36   : > { %3967 = vmatprep.mubr.msk.f32.mxu0 %vm512_vm0, %v4904_v33 }
  0x39   : > { %3968 = vmatmul.mubr.msk.f32.gmra.mrb[14].mxu0 %vm512_vm0, %v4911_v34 }
  0xf0   : > { %v3948_v40 = vpop.f32.mrb[0].mxu0 }
  0xf1   : > { %v627_v41 = vpop.f32.mrb[1].mxu0 }
  0xf2   : > { %3992 = vmatprep.mubr.msk.f32.mxu1 %vm512_vm0, %v627_v41 }
  0xf3   : > { %3993 = vmatmul.mubr.msk.f32.vlgmr.msra.gmra.mrb[0].mxu1 %vm512_vm0, %v3948_v40 }
  0xf4   : > { %v3951_v45 = vpop.f32.mrb[2].mxu0  ;;  %4346 = vmatpush3.bf16.msra.mxu1 %v4921_v37 }
  0xf5   : > { %v637_v46 = vpop.f32.mrb[3].mxu0  ;;  %4348 = vmatprep.subr.bf16.mxu1 %v4930_v42 }
  0xf6   : > { %3995 = vmatprep.mubr.msk.f32.mxu1 %vm512_vm0, %v637_v46 }
  0xf7   : > { %3996 = vmatmul.mubr.msk.f32.gmra.mrb[2].mxu1 %vm512_vm0, %v3951_v45  ;;  %v5028_v45 = vld [vmem:[%s475_s17 + $0x10] sm:$0xff] }
  0xf8   : > { %v3954_v50 = vpop.f32.mrb[4].mxu0  ;;  %4350 = vmatpush3.bf16.msra.mxu1 %v4930_v42 }
  0xf9   : > { %v647_v51 = vpop.f32.mrb[5].mxu0  ;;  %4352 = vmatprep.subr.bf16.mxu1 %v4942_v47 }
  0xfa   : > { %4006 = vmatprep.mubr.msk.f32.mxu1 %vm512_vm0, %v647_v51 }
  0xfb   : > { %4007 = vmatmul.mubr.msk.f32.vlgmr.msra.gmra.mrb[0].mxu1 %vm512_vm0, %v3954_v50 }
  0xfc   : > { %v3957_v55 = vpop.f32.mrb[6].mxu0  ;;  %4354 = vmatpush3.bf16.msra.mxu1 %v4942_v47 }
  0xfd   : > { %v657_v56 = vpop.f32.mrb[7].mxu0  ;;  %4356 = vmatprep.subr.bf16.mxu1 %v4954_v52 }
  0xfe   : > { %4009 = vmatprep.mubr.msk.f32.mxu1 %vm512_vm0, %v657_v56 }
  0xff   : > { %4010 = vmatmul.mubr.msk.f32.gmra.mrb[2].mxu1 %vm512_vm0, %v3957_v55 }
 0x100   : > { %v3960_v60 = vpop.f32.mrb[8].mxu0  ;;  %4358 = vmatpush3.bf16.msra.mxu1 %v4954_v52 }
 0x101   : > { %v667_v61 = vpop.f32.mrb[9].mxu0  ;;  %4360 = vmatprep.subr.bf16.mxu1 %v4966_v57 }
 0x102   : > { %4020 = vmatprep.mubr.msk.f32.mxu1 %vm512_vm0, %v667_v61 }
 0x103   : > { %4021 = vmatmul.mubr.msk.f32.vlgmr.msra.gmra.mrb[0].mxu1 %vm512_vm0, %v3960_v60 }
 0x104   : > { %v3963_v63 = vpop.f32.mrb[10].mxu0  ;;  %4362 = vmatpush3.bf16.msra.mxu1 %v4966_v57 }
 0x105   : > { %v677_v0 = vpop.f32.mrb[11].mxu0  ;;  %4364 = vmatprep.subr.bf16.mxu1 %v4978_v62 }
 0x106   : > { %4023 = vmatprep.mubr.msk.f32.mxu1 %vm512_vm0, %v677_v0 }
 0x107   : > { %4024 = vmatmul.mubr.msk.f32.gmra.mrb[2].mxu1 %vm512_vm0, %v3963_v63 }
 0x108   : > { %v3966_v1 = vpop.f32.mrb[12].mxu0  ;;  %4366 = vmatpush3.bf16.msra.mxu1 %v4978_v62 }
 0x109   : > { %v687_v2 = vpop.f32.mrb[13].mxu0  ;;  %4384 = vmatprep.subr.bf16.mxu1 %v4773_v4 }
 0x10a   : > { %4034 = vmatprep.mubr.msk.f32.mxu1 %vm512_vm0, %v687_v2 }
 0x10b   : > { %4035 = vmatmul.mubr.msk.f32.vlgmr.msra.gmra.mrb[0].mxu1 %vm512_vm0, %v3966_v1 }
 0x10c   : > { %v3969_v3 = vpop.f32.mrb[14].mxu0  ;;  %4386 = vmatpush3.bf16.msra.mxu1 %v4773_v4 }
 0x10d   : > { %v697_v5 = vpop.f32.mrb[15].mxu0  ;;  %4388 = vmatprep.subr.bf16.mxu1 %v4778_v6 }
 0x10e   : > { %4037 = vmatprep.mubr.msk.f32.mxu1 %vm512_vm0, %v697_v5 }
 0x10f   : > { %4038 = vmatmul.mubr.msk.f32.gmra.mrb[2].mxu1 %vm512_vm0, %v3969_v3 }
 0x110   : > { %4390 = vmatpush3.bf16.msra.mxu1 %v4778_v6 }
 0x111   : > { %4392 = vmatprep.subr.bf16.mxu1 %v4791_v9 }
 0x1de   : > { %v4036_v38 = vpop.f32.mrb[0].mxu1 }
 0x1df   : > { %v4503_v39 = vadd.f32 %v4036_v38, %v5020_v35  ;;  %v1200_v40 = vpop.f32.mrb[1].mxu1 }
 0x1e0   : > { %v4504_v41 = vadd.f32 %v1200_v40, %v5022_v36 }
 0x1e1   : > { %v3601_v44 = vmul.f32 -1.442695, %v4503_v39 }
 0x1e2   : > { %v3600_v46 = vmul.f32 -1.442695, %v4504_v41  ;;  %v4039_v48 = vpop.f32.mrb[2].mxu1 }
 0x1e3   : > { %4582 = vpow2.f32 %v3601_v44  ;;  %v4505_v49 = vadd.f32 %v4039_v48, %v5026_v43  ;;  %v1210_v50 = vpop.f32.mrb[3].mxu1 }
 0x1e4   : > { %4584 = vpow2.f32 %v3600_v46  ;;  %v4506_v51 = vadd.f32 %v1210_v50, %v5028_v45 }
 0x1e5   : > { %v3603_v53 = vmul.f32 -1.442695, %v4505_v49 }
 0x1e6   : > { %v3602_v54 = vmul.f32 -1.442695, %v4506_v51 }
 0x1e7   : > { %4586 = vpow2.f32 %v3603_v53 }
 0x1e8   : > { %4588 = vpow2.f32 %v3602_v54 }
 0x1ed   : > { %v4583_v55 = vpop.eup %4582 }
 0x1ee   : > { %v4585_v56 = vpop.eup %4584  ;;  %v1236_v58 = vadd.f32 1.0, %v4583_v55 }
 0x1ef   : > { %v1235_v59 = vadd.f32 1.0, %v4585_v56 }
 0x1f0   : > { %4590 = vrcp.f32 %v1236_v58 }
 0x1f1   : > { %v4587_v60 = vpop.eup %4586  ;;  %4592 = vrcp.f32 %v1235_v59 }
 0x1f2   : > { %v4589_v61 = vpop.eup %4588  ;;  %v1238_v63 = vadd.f32 1.0, %v4587_v60 }
 0x1f3   : > { %v1237_v0 = vadd.f32 1.0, %v4589_v61 }
 0x1f4   : > { %4594 = vrcp.f32 %v1238_v63 }
 0x1f5   : > { %4596 = vrcp.f32 %v1237_v0 }
 0x1fa   : > { %v4591_v1 = vpop.eup %4590 }
 0x1fb   : > { %v4593_v2 = vpop.eup %4592  ;;  %v1248_v5 = vmul.f32 %v4591_v1, %v4805_v13 }
 0x1fc   : > { %v1247_v3 = vmul.f32 %v4593_v2, %v4803_v12 }
 0x1fe   : > { %v4595_v7 = vpop.eup %4594  ;;  %4048 = vmatprep.mubr.msk.f32.mxu0 %vm512_vm0, %v1247_v3 }
 0x1ff   : > { %v4597_v8 = vpop.eup %4596  ;;  %4049 = vmatmul.mubr.msk.f32.vlgmr.msra.gmra.mrb[16].mxu0 %vm512_vm0, %v1248_v5  ;;  %v1250_v15 = vmul.f32 %v4595_v7, %v4816_v16 }
 0x200   : > { %v1249_v11 = vmul.f32 %v4597_v8, %v4807_v14 }
 0x202   : > { %4051 = vmatprep.mubr.msk.f32.mxu0 %vm512_vm0, %v1249_v11 }
 0x203   : > { %4052 = vmatmul.mubr.msk.f32.gmra.mrb[18].mxu0 %vm512_vm0, %v1250_v15 }
 0x204   : > { %4062 = vmatprep.mubr.msk.f32.mxu0 %vm512_vm0, %v4819_v17 }
 0x2d2   : > { %v4050_v38 = vpop.f32.mrb[16].mxu0 }
 0x2d3   : > { %v1329_v40 = vpop.f32.mrb[17].mxu0 }
 0x2d4   : > { %1352 = vrot.lane.b32.xlu0 %v1329_v40, %s4678_s18 }
 0x2d6   : > { %v4053_v44 = vpop.f32.mrb[18].mxu0 }
 0x2d7   : > { %v1339_v46 = vpop.f32.mrb[19].mxu0 }
 0x2d8   : > { %1354 = vrot.lane.b32.xlu0 %v4050_v38, %s4678_s18  ;;  %1356 = vrot.lane.b32.xlu1 %v1339_v46, %s4678_s18 }
 0x2dc   : > { %1358 = vrot.lane.b32.xlu1 %v4053_v44, %s4678_s18  ;;  %1372 = vrot.lane.b32.xlu0 %v4803_v12, %s4678_s18 }
 0x2e0   : > { %1376 = vrot.lane.b32.xlu0 %v4807_v14, %s4678_s18  ;;  %1374 = vrot.lane.b32.xlu1 %v4805_v13, %s4678_s18 }
 0x2e4   : > { %1378 = vrot.lane.b32.xlu1 %v4816_v16, %s4678_s18 }
 0x346   : > { %v1353_v48 = vpop.permute.xlu0 %1352 }
 0x347   : > { %v1364_v50 = vadd.f32 %v4504_v41, %v1353_v48 }
 0x349   : > { %4598 = vtanh.f32 %v1364_v50 }
 0x34a   : > { %v1355_v53 = vpop.permute.xlu0 %1354  ;;  %v1357_v54 = vpop.permute.xlu1 %1356 }
 0x34b   : > { %v1365_v55 = vadd.f32 %v4503_v39, %v1355_v53  ;;  %v1366_v56 = vadd.f32 %v4506_v51, %v1357_v54 }
 0x34d   : > { %4600 = vtanh.f32 %v1365_v55 }
 0x34e   : > { %4602 = vtanh.f32 %v1366_v56  ;;  %v1359_v58 = vpop.permute.xlu1 %1358  ;;  %v1373_v60 = vpop.permute.xlu0 %1372 }
 0x34f   : > { %v1367_v59 = vadd.f32 %v4505_v49, %v1359_v58 }
 0x351   : > { %4604 = vtanh.f32 %v1367_v59 }
 0x352   : > { %v1375_v63 = vpop.permute.xlu1 %1374  ;;  %v1377_v3 = vpop.permute.xlu0 %1376 }
 0x353   : > { %v4599_v61 = vpop.eup %4598 }
 0x354   : > { %v1384_v0 = vsub.f32 %v4599_v61, %v1373_v60 }
 0x356   : > { %1392 = vrot.lane.b32.xlu0 %v1384_v0, %s4679_s19  ;;  %v1379_v38 = vpop.permute.xlu1 %1378 }
 0x357   : > { %v4601_v5 = vpop.eup %4600 }
 0x358   : > { %v4603_v41 = vpop.eup %4602  ;;  %v1385_v11 = vsub.f32 %v4601_v5, %v1375_v63 }
 0x359   : > { %v1386_v15 = vsub.f32 %v4603_v41, %v1377_v3 }
 0x35a   : > { %1394 = vrot.lane.b32.xlu1 %v1385_v11, %s4679_s19 }
 0x35b   : > { %v4605_v39 = vpop.eup %4604  ;;  %1396 = vrot.lane.b32.xlu0 %v1386_v15, %s4679_s19 }
 0x35c   : > { %v1387_v49 = vsub.f32 %v4605_v39, %v1379_v38 }
 0x35e   : > { %1398 = vrot.lane.b32.xlu1 %v1387_v49, %s4679_s19 }
 0x3c8   : > { %v1393_v51 = vpop.permute.xlu0 %1392 }
 0x3c9   : > { %v1404_v40 = vmul.f32 %v4593_v2, %v1393_v51 }
 0x3cb   : > { %1412 = vrot.lane.b32.xlu0 %v1404_v40, %s4679_s19 }
 0x3cc   : > { %v1395_v44 = vpop.permute.xlu1 %1394 }
 0x3cd   : > { %v1397_v46 = vpop.permute.xlu0 %1396  ;;  %v1405_v48 = vmul.f32 %v4591_v1, %v1395_v44 }
 0x3ce   : > { %v1406_v50 = vmul.f32 %v4597_v8, %v1397_v46 }
 0x3cf   : > { %1414 = vrot.lane.b32.xlu1 %v1405_v48, %s4679_s19 }
 0x3d0   : > { %1416 = vrot.lane.b32.xlu0 %v1406_v50, %s4679_s19  ;;  %v1399_v53 = vpop.permute.xlu1 %1398 }
 0x3d1   : > { %v1407_v54 = vmul.f32 %v4595_v7, %v1399_v53 }
 0x3d3   : > { %1418 = vrot.lane.b32.xlu1 %v1407_v54, %s4679_s19 }
 0x43d   : > { %v1413_v55 = vpop.permute.xlu0 %1412 }
 0x43e   : > { %v5063_v56 = vadd.f32 %v1413_v55, %v4803_v12 }
 0x440   : > { %4094 = vmatprep.mubr.msk.f32.mxu1 %vm512_vm0, %v5063_v56 }
 0x441   : > { %v1415_v2 = vpop.permute.xlu1 %1414 }
 0x442   : > { %v1417_v58 = vpop.permute.xlu0 %1416  ;;  %v5068_v1 = vadd.f32 %v1415_v2, %v4805_v13 }
 0x443   : > { %v5071_v8 = vadd.f32 %v1417_v58, %v4807_v14 }
 0x444   : > { %4095 = vmatmul.mubr.msk.f32.vlgmr.msra.gmra.mrb[4].mxu1 %vm512_vm0, %v5068_v1  ;;  %v4375_v7 = vpack.c.bf16 %v5068_v1, %v5063_v56 }
 0x445   : > { %4097 = vmatprep.mubr.msk.f32.mxu1 %vm512_vm0, %v5071_v8  ;;  %v1419_v12 = vpop.permute.xlu1 %1418  ;;  %4394 = vmatpush3.bf16.msra.mxu1 %v4791_v9 }
 0x446   : > { %v5081_v59 = vadd.f32 %v1419_v12, %v4816_v16  ;;  %4376 = vmatprep.subr.bf16.mxu0 %v4375_v7  ;;  %4396 = vmatprep.subr.bf16.mxu1 %v4829_v19 }
 0x447   : > { %4378 = vmatpush3.bf16.msra.mxu0 %v4375_v7 }
 0x448   : > { %4098 = vmatmul.mubr.msk.f32.gmra.mrb[6].mxu1 %vm512_vm0, %v5081_v59  ;;  %v4379_v13 = vpack.c.bf16 %v5081_v59, %v5071_v8 }
 0x449   : > { %4398 = vmatpush3.bf16.msra.mxu1 %v4829_v19 }
 0x44a   : > { %4380 = vmatprep.subr.bf16.mxu0 %v4379_v13  ;;  %4400 = vmatprep.subr.bf16.mxu1 %v4921_v37 }
 0x44b   : > { %4382 = vmatpush3.bf16.msra.mxu0 %v4379_v13 }
 0x44c   : > { %4424 = vmatprep.subr.bf16.mxu0 %v5002_v10 }
 0x44e   : > { %4063 = vmatmul.mubr.msk.f32.vlgmr.msra.gmra.mrb[20].mxu0 %vm512_vm0, %v4838_v20 }
 0x44f   : > { %4065 = vmatprep.mubr.msk.f32.mxu0 %vm512_vm0, %v4843_v21  ;;  %4426 = vmatpush3.bf16.msra.mxu0 %v5002_v10 }
 0x450   : > { %4428 = vmatprep.subr.bf16.mxu0 %v5012_v18 }
 0x452   : > { %4066 = vmatmul.mubr.msk.f32.gmra.mrb[22].mxu0 %vm512_vm0, %v4851_v22 }
 0x453   : > { %4068 = vmatprep.mubr.msk.f32.mxu0 %vm512_vm0, %v4854_v23  ;;  %4430 = vmatpush3.bf16.msra.mxu0 %v5012_v18 }
 0x456   : > { %4069 = vmatmul.mubr.msk.f32.gmra.mrb[24].mxu0 %vm512_vm0, %v4861_v24 }
 0x457   : > { %4071 = vmatprep.mubr.msk.f32.mxu0 %vm512_vm0, %v4864_v25 }
 0x45a   : > { %4072 = vmatmul.mubr.msk.f32.gmra.mrb[26].mxu0 %vm512_vm0, %v4871_v26 }
 0x45b   : > { %4074 = vmatprep.mubr.msk.f32.mxu0 %vm512_vm0, %v4874_v27 }
 0x45e   : > { %4075 = vmatmul.mubr.msk.f32.gmra.mrb[28].mxu0 %vm512_vm0, %v4881_v28 }
 0x45f   : > { %4077 = vmatprep.mubr.msk.f32.mxu0 %vm512_vm0, %v4884_v29 }
 0x462   : > { %4078 = vmatmul.mubr.msk.f32.gmra.mrb[30].mxu0 %vm512_vm0, %v4891_v30 }
 0x463   : > { %4080 = vmatprep.mubr.msk.f32.mxu0 %vm512_vm0, %v4894_v31 }
 0x466   : > { %4081 = vmatmul.mubr.msk.f32.gmra.mrb[32].mxu0 %vm512_vm0, %v4901_v32 }
 0x467   : > { %4083 = vmatprep.mubr.msk.f32.mxu0 %vm512_vm0, %v4904_v33 }
 0x46a   : > { %4084 = vmatmul.mubr.msk.f32.gmra.mrb[34].mxu0 %vm512_vm0, %v4911_v34 }
 0x521   : > { %v4064_v14 = vpop.f32.mrb[20].mxu0 }
 0x522   : > { %v1494_v16 = vpop.f32.mrb[21].mxu0 }
 0x523   : > { %4108 = vmatprep.mubr.msk.f32.mxu1 %vm512_vm0, %v1494_v16 }
 0x524   : > { %4109 = vmatmul.mubr.msk.f32.vlgmr.msra.gmra.mrb[4].mxu1 %vm512_vm0, %v4064_v14 }
 0x525   : > { %v4067_v60 = vpop.f32.mrb[22].mxu0  ;;  %4402 = vmatpush3.bf16.msra.mxu1 %v4921_v37 }
 0x526   : > { %v1504_v61 = vpop.f32.mrb[23].mxu0  ;;  %4404 = vmatprep.subr.bf16.mxu1 %v4930_v42 }
 0x527   : > { %4111 = vmatprep.mubr.msk.f32.mxu1 %vm512_vm0, %v1504_v61 }
 0x528   : > { %4112 = vmatmul.mubr.msk.f32.gmra.mrb[6].mxu1 %vm512_vm0, %v4067_v60 }
 0x529   : > { %v4070_v63 = vpop.f32.mrb[24].mxu0  ;;  %4406 = vmatpush3.bf16.msra.mxu1 %v4930_v42 }
 0x52a   : > { %v1514_v0 = vpop.f32.mrb[25].mxu0  ;;  %4408 = vmatprep.subr.bf16.mxu1 %v4942_v47 }
 0x52b   : > { %4122 = vmatprep.mubr.msk.f32.mxu1 %vm512_vm0, %v1514_v0 }
 0x52c   : > { %4123 = vmatmul.mubr.msk.f32.vlgmr.msra.gmra.mrb[4].mxu1 %vm512_vm0, %v4070_v63 }
 0x52d   : > { %v4073_v3 = vpop.f32.mrb[26].mxu0  ;;  %4410 = vmatpush3.bf16.msra.mxu1 %v4942_v47 }
 0x52e   : > { %v1524_v5 = vpop.f32.mrb[27].mxu0  ;;  %4412 = vmatprep.subr.bf16.mxu1 %v4954_v52 }
 0x52f   : > { %4125 = vmatprep.mubr.msk.f32.mxu1 %vm512_vm0, %v1524_v5 }
 0x530   : > { %4126 = vmatmul.mubr.msk.f32.gmra.mrb[6].mxu1 %vm512_vm0, %v4073_v3 }
 0x531   : > { %v4076_v41 = vpop.f32.mrb[28].mxu0  ;;  %4414 = vmatpush3.bf16.msra.mxu1 %v4954_v52 }
 0x532   : > { %v1534_v11 = vpop.f32.mrb[29].mxu0  ;;  %4416 = vmatprep.subr.bf16.mxu1 %v4966_v57 }
 0x533   : > { %4136 = vmatprep.mubr.msk.f32.mxu1 %vm512_vm0, %v1534_v11 }
 0x534   : > { %4137 = vmatmul.mubr.msk.f32.vlgmr.msra.gmra.mrb[4].mxu1 %vm512_vm0, %v4076_v41 }
 0x535   : > { %v4079_v15 = vpop.f32.mrb[30].mxu0  ;;  %4418 = vmatpush3.bf16.msra.mxu1 %v4966_v57 }
 0x536   : > { %v1544_v38 = vpop.f32.mrb[31].mxu0  ;;  %4420 = vmatprep.subr.bf16.mxu1 %v4978_v62 }
 0x537   : > { %4139 = vmatprep.mubr.msk.f32.mxu1 %vm512_vm0, %v1544_v38 }
 0x538   : > { %4140 = vmatmul.mubr.msk.f32.gmra.mrb[6].mxu1 %vm512_vm0, %v4079_v15 }
 0x539   : > { %v4082_v39 = vpop.f32.mrb[32].mxu0  ;;  %4422 = vmatpush3.bf16.msra.mxu1 %v4978_v62 }
 0x53a   : > { %v1554_v49 = vpop.f32.mrb[33].mxu0  ;;  %4440 = vmatprep.subr.bf16.mxu1 %v4773_v4 }
 0x53b   : > { %4150 = vmatprep.mubr.msk.f32.mxu1 %vm512_vm0, %v1554_v49 }
 0x53c   : > { %4151 = vmatmul.mubr.msk.f32.vlgmr.msra.gmra.mrb[4].mxu1 %vm512_vm0, %v4082_v39 }
 0x53d   : > { %v4085_v51 = vpop.f32.mrb[34].mxu0  ;;  %4442 = vmatpush3.bf16.msra.mxu1 %v4773_v4 }
 0x53e   : > { %v1564_v40 = vpop.f32.mrb[35].mxu0  ;;  %4444 = vmatprep.subr.bf16.mxu1 %v4778_v6 }
 0x53f   : > { %4153 = vmatprep.mubr.msk.f32.mxu1 %vm512_vm0, %v1564_v40 }
 0x540   : > { %4154 = vmatmul.mubr.msk.f32.gmra.mrb[6].mxu1 %vm512_vm0, %v4085_v51 }
 0x541   : > { %4446 = vmatpush3.bf16.msra.mxu1 %v4778_v6 }
 0x542   : > { %4448 = vmatprep.subr.bf16.mxu1 %v4791_v9 }
 0x60f   : > { %v4152_v44 = vpop.f32.mrb[4].mxu1 }
 0x610   : > { %v4507_v46 = vadd.f32 %v4152_v44, %v5020_v35  ;;  %v2051_v48 = vpop.f32.mrb[5].mxu1 }
 0x611   : > { %v4508_v50 = vadd.f32 %v2051_v48, %v5022_v36 }
 0x612   : > { %v3645_v53 = vmul.f32 -1.442695, %v4507_v46 }
 0x613   : > { %v3644_v54 = vmul.f32 -1.442695, %v4508_v50  ;;  %v4155_v4 = vpop.f32.mrb[6].mxu1 }
 0x614   : > { %4606 = vpow2.f32 %v3645_v53  ;;  %v4509_v55 = vadd.f32 %v4155_v4, %v5026_v43  ;;  %v2061_v2 = vpop.f32.mrb[7].mxu1 }
 0x615   : > { %4608 = vpow2.f32 %v3644_v54  ;;  %v4510_v58 = vadd.f32 %v2061_v2, %v5028_v45 }
 0x616   : > { %v3647_v7 = vmul.f32 -1.442695, %v4509_v55 }
 0x617   : > { %v3646_v6 = vmul.f32 -1.442695, %v4510_v58 }
 0x618   : > { %4610 = vpow2.f32 %v3647_v7 }
 0x619   : > { %4612 = vpow2.f32 %v3646_v6 }
 0x61e   : > { %v4607_v12 = vpop.eup %4606 }
 0x61f   : > { %v4609_v13 = vpop.eup %4608  ;;  %v2087_v14 = vadd.f32 1.0, %v4607_v12 }
 0x620   : > { %v2086_v16 = vadd.f32 1.0, %v4609_v13 }
 0x621   : > { %4614 = vrcp.f32 %v2087_v14 }
 0x622   : > { %v4611_v60 = vpop.eup %4610  ;;  %4616 = vrcp.f32 %v2086_v16 }
 0x623   : > { %v4613_v61 = vpop.eup %4612  ;;  %v2089_v63 = vadd.f32 1.0, %v4611_v60 }
 0x624   : > { %v2088_v0 = vadd.f32 1.0, %v4613_v61 }
 0x625   : > { %4618 = vrcp.f32 %v2089_v63 }
 0x626   : > { %4620 = vrcp.f32 %v2088_v0 }
 0x62b   : > { %v4615_v3 = vpop.eup %4614 }
 0x62c   : > { %v4617_v5 = vpop.eup %4616  ;;  %v2099_v11 = vmul.f32 %v4615_v3, %v5068_v1 }
 0x62d   : > { %v2098_v41 = vmul.f32 %v4617_v5, %v5063_v56 }
 0x62f   : > { %v4619_v15 = vpop.eup %4618  ;;  %4164 = vmatprep.mubr.msk.f32.mxu0 %vm512_vm0, %v2098_v41 }
 0x630   : > { %v4621_v38 = vpop.eup %4620  ;;  %4165 = vmatmul.mubr.msk.f32.vlgmr.msra.gmra.mrb[36].mxu0 %vm512_vm0, %v2099_v11  ;;  %v2101_v49 = vmul.f32 %v4619_v15, %v5081_v59 }
 0x631   : > { %v2100_v39 = vmul.f32 %v4621_v38, %v5071_v8 }
 0x633   : > { %4167 = vmatprep.mubr.msk.f32.mxu0 %vm512_vm0, %v2100_v39 }
 0x634   : > { %4168 = vmatmul.mubr.msk.f32.gmra.mrb[38].mxu0 %vm512_vm0, %v2101_v49 }
 0x635   : > { %4178 = vmatprep.mubr.msk.f32.mxu0 %vm512_vm0, %v4819_v17 }
 0x703   : > { %v4166_v51 = vpop.f32.mrb[36].mxu0 }
 0x704   : > { %2205 = vrot.lane.b32.xlu1 %v4166_v51, %s4678_s18  ;;  %v2180_v40 = vpop.f32.mrb[37].mxu0 }
 0x705   : > { %2203 = vrot.lane.b32.xlu0 %v2180_v40, %s4678_s18 }
 0x707   : > { %v4169_v44 = vpop.f32.mrb[38].mxu0 }
 0x708   : > { %2209 = vrot.lane.b32.xlu1 %v4169_v44, %s4678_s18  ;;  %v2190_v48 = vpop.f32.mrb[39].mxu0 }
 0x709   : > { %2207 = vrot.lane.b32.xlu0 %v2190_v48, %s4678_s18 }
 0x70c   : > { %2225 = vrot.lane.b32.xlu1 %v5068_v1, %s4678_s18 }
 0x70d   : > { %2223 = vrot.lane.b32.xlu0 %v5063_v56, %s4678_s18 }
 0x710   : > { %2229 = vrot.lane.b32.xlu1 %v5081_v59, %s4678_s18 }
 0x711   : > { %2227 = vrot.lane.b32.xlu0 %v5071_v8, %s4678_s18 }
 0x776   : > { %v2206_v17 = vpop.permute.xlu1 %2205 }
 0x777   : > { %v2216_v53 = vadd.f32 %v4507_v46, %v2206_v17  ;;  %v2204_v54 = vpop.permute.xlu0 %2203 }
 0x778   : > { %v2215_v4 = vadd.f32 %v4508_v50, %v2204_v54 }
 0x779   : > { %4622 = vtanh.f32 %v2216_v53 }
 0x77a   : > { %4624 = vtanh.f32 %v2215_v4  ;;  %v2210_v2 = vpop.permute.xlu1 %2209 }
 0x77b   : > { %v2218_v7 = vadd.f32 %v4509_v55, %v2210_v2  ;;  %v2208_v6 = vpop.permute.xlu0 %2207 }
 0x77c   : > { %v2217_v12 = vadd.f32 %v4510_v58, %v2208_v6 }
 0x77d   : > { %4626 = vtanh.f32 %v2218_v7 }
 0x77e   : > { %4628 = vtanh.f32 %v2217_v12  ;;  %v2226_v13 = vpop.permute.xlu1 %2225 }
 0x77f   : > { %v2224_v14 = vpop.permute.xlu0 %2223 }
 0x782   : > { %v2230_v46 = vpop.permute.xlu1 %2229 }
 0x783   : > { %v4623_v16 = vpop.eup %4622  ;;  %v2228_v11 = vpop.permute.xlu0 %2227 }
 0x784   : > { %v4625_v60 = vpop.eup %4624  ;;  %v2236_v61 = vsub.f32 %v4623_v16, %v2226_v13 }
 0x785   : > { %v2235_v63 = vsub.f32 %v4625_v60, %v2224_v14 }
 0x786   : > { %2245 = vrot.lane.b32.xlu1 %v2236_v61, %s4679_s19 }
 0x787   : > { %v4627_v0 = vpop.eup %4626  ;;  %2243 = vrot.lane.b32.xlu0 %v2235_v63, %s4679_s19 }
 0x788   : > { %v4629_v50 = vpop.eup %4628  ;;  %v2238_v41 = vsub.f32 %v4627_v0, %v2230_v46 }
 0x789   : > { %v2237_v55 = vsub.f32 %v4629_v50, %v2228_v11 }
 0x78a   : > { %2249 = vrot.lane.b32.xlu1 %v2238_v41, %s4679_s19 }
 0x78b   : > { %2247 = vrot.lane.b32.xlu0 %v2237_v55, %s4679_s19 }
 0x7f8   : > { %v2246_v58 = vpop.permute.xlu1 %2245 }
 0x7f9   : > { %v2256_v39 = vmul.f32 %v4615_v3, %v2246_v58  ;;  %v2244_v49 = vpop.permute.xlu0 %2243 }
 0x7fa   : > { %v2255_v51 = vmul.f32 %v4617_v5, %v2244_v49 }
 0x7fb   : > { %2265 = vrot.lane.b32.xlu1 %v2256_v39, %s4679_s19 }
 0x7fc   : > { %v2250_v40 = vpop.permute.xlu1 %2249  ;;  %2263 = vrot.lane.b32.xlu0 %v2255_v51, %s4679_s19 }
 0x7fd   : > { %v2258_v44 = vmul.f32 %v4619_v15, %v2250_v40  ;;  %v2248_v48 = vpop.permute.xlu0 %2247 }
 0x7fe   : > { %v2257_v17 = vmul.f32 %v4621_v38, %v2248_v48 }
 0x7ff   : > { %2269 = vrot.lane.b32.xlu1 %v2258_v44, %s4679_s19 }
 0x800   : > { %2267 = vrot.lane.b32.xlu0 %v2257_v17, %s4679_s19 }
 0x86d   : > { %v2266_v53 = vpop.permute.xlu1 %2265 }
 0x86e   : > { %v5191_v54 = vadd.f32 %v2266_v53, %v5068_v1  ;;  %v2264_v4 = vpop.permute.xlu0 %2263 }
 0x86f   : > { %v5194_v3 = vadd.f32 %v2264_v4, %v5063_v56 }
 0x871   : > { %v2270_v5 = vpop.permute.xlu1 %2269  ;;  %4210 = vmatprep.mubr.msk.f32.mxu1 %vm512_vm0, %v5194_v3  ;;  %v4431_v15 = vpack.c.bf16 %v5191_v54, %v5194_v3 }
 0x872   : > { %v5201_v38 = vadd.f32 %v2270_v5, %v5081_v59  ;;  %4211 = vmatmul.mubr.msk.f32.vlgmr.msra.gmra.mrb[8].mxu1 %vm512_vm0, %v5191_v54  ;;  %v2268_v2 = vpop.permute.xlu0 %2267  ;;  %v3138_v5 = vld [vmem:[%s5386_s8] sm:$0xff] }
 0x873   : > { %v5206_v1 = vadd.f32 %v2268_v2, %v5071_v8  ;;  %4432 = vmatprep.subr.bf16.mxu0 %v4431_v15  ;;  %4450 = vmatpush3.bf16.msra.mxu1 %v4791_v9  ;;  %v3131_v2 = vld [vmem:[%s5385_s7 + $0x8] sm:$0xff] }
 0x874   : > { %4434 = vmatpush3.bf16.msra.mxu0 %v4431_v15  ;;  %4452 = vmatprep.subr.bf16.mxu1 %v4829_v19  ;;  %v3130_v15 = vld [vmem:[%s5385_s7] sm:$0xff] }
 0x875   : > { %4213 = vmatprep.mubr.msk.f32.mxu1 %vm512_vm0, %v5206_v1  ;;  %v4435_v56 = vpack.c.bf16 %v5201_v38, %v5206_v1 }
 0x876   : > { %4214 = vmatmul.mubr.msk.f32.gmra.mrb[10].mxu1 %vm512_vm0, %v5201_v38 }
 0x877   : > { %4436 = vmatprep.subr.bf16.mxu0 %v4435_v56  ;;  %4454 = vmatpush3.bf16.msra.mxu1 %v4829_v19 }
 0x878   : > { %4438 = vmatpush3.bf16.msra.mxu0 %v4435_v56  ;;  %4456 = vmatprep.subr.bf16.mxu1 %v4921_v37 }
 0x879   : > { %4480 = vmatprep.subr.bf16.mxu0 %v5002_v10 }
 0x87b   : > { %4179 = vmatmul.mubr.msk.f32.vlgmr.msra.gmra.mrb[40].mxu0 %vm512_vm0, %v4838_v20 }
 0x87c   : > { %4181 = vmatprep.mubr.msk.f32.mxu0 %vm512_vm0, %v4843_v21  ;;  %4482 = vmatpush3.bf16.msra.mxu0 %v5002_v10 }
 0x87d   : > { %4484 = vmatprep.subr.bf16.mxu0 %v5012_v18 }
 0x87f   : > { %4182 = vmatmul.mubr.msk.f32.gmra.mrb[42].mxu0 %vm512_vm0, %v4851_v22 }
 0x880   : > { %4184 = vmatprep.mubr.msk.f32.mxu0 %vm512_vm0, %v4854_v23  ;;  %4486 = vmatpush3.bf16.msra.mxu0 %v5012_v18 }
 0x881   : > { %4286 = vmatprep.subr.mxu0 %v3138_v5 }
 0x883   : > { %4185 = vmatmul.mubr.msk.f32.gmra.mrb[44].mxu0 %vm512_vm0, %v4861_v24 }
 0x884   : > { %4187 = vmatprep.mubr.msk.f32.mxu0 %vm512_vm0, %v4864_v25 }
 0x887   : > { %4188 = vmatmul.mubr.msk.f32.gmra.mrb[46].mxu0 %vm512_vm0, %v4871_v26 }
 0x888   : > { %4190 = vmatprep.mubr.msk.f32.mxu0 %vm512_vm0, %v4874_v27 }
 0x88b   : > { %4191 = vmatmul.mubr.msk.f32.gmra.mrb[48].mxu0 %vm512_vm0, %v4881_v28 }
 0x88c   : > { %4193 = vmatprep.mubr.msk.f32.mxu0 %vm512_vm0, %v4884_v29 }
 0x88f   : > { %4194 = vmatmul.mubr.msk.f32.gmra.mrb[50].mxu0 %vm512_vm0, %v4891_v30 }
 0x890   : > { %4196 = vmatprep.mubr.msk.f32.mxu0 %vm512_vm0, %v4894_v31 }
 0x893   : > { %4197 = vmatmul.mubr.msk.f32.gmra.mrb[52].mxu0 %vm512_vm0, %v4901_v32 }
 0x894   : > { %4199 = vmatprep.mubr.msk.f32.mxu0 %vm512_vm0, %v4904_v33 }
 0x897   : > { %4200 = vmatmul.mubr.msk.f32.gmra.mrb[54].mxu0 %vm512_vm0, %v4911_v34 }
 0x94e   : > { %v4180_v9 = vpop.f32.mrb[40].mxu0 }
 0x94f   : > { %v2345_v19 = vpop.f32.mrb[41].mxu0 }
 0x950   : > { %4224 = vmatprep.mubr.msk.f32.mxu1 %vm512_vm0, %v2345_v19  ;;  %v3135_v19 = vld [vmem:[%s5322_s28 + $0x8] sm:$0xff] }
 0x951   : > { %4225 = vmatmul.mubr.msk.f32.vlgmr.msra.gmra.mrb[8].mxu1 %vm512_vm0, %v4180_v9  ;;  %v3134_v9 = vld [vmem:[%s5322_s28] sm:$0xff] }
 0x952   : > { %v4183_v20 = vpop.f32.mrb[42].mxu0  ;;  %4458 = vmatpush3.bf16.msra.mxu1 %v4921_v37 }
 0x953   : > { %v2355_v21 = vpop.f32.mrb[43].mxu0  ;;  %4460 = vmatprep.subr.bf16.mxu1 %v4930_v42 }
 0x954   : > { %4227 = vmatprep.mubr.msk.f32.mxu1 %vm512_vm0, %v2355_v21  ;;  %v3136_v21 = vld [vmem:[%s5322_s28 + $0x10] sm:$0xff] }
 0x955   : > { %4228 = vmatmul.mubr.msk.f32.gmra.mrb[10].mxu1 %vm512_vm0, %v4183_v20  ;;  %v4487_v20 = vpack.c.bf16 %v3131_v2, %v3130_v15 }
 0x956   : > { %v4186_v22 = vpop.f32.mrb[44].mxu0  ;;  %4462 = vmatpush3.bf16.msra.mxu1 %v4930_v42 }
 0x957   : > { %v2365_v23 = vpop.f32.mrb[45].mxu0  ;;  %4464 = vmatprep.subr.bf16.mxu1 %v4942_v47 }
 0x958   : > { %4238 = vmatprep.mubr.msk.f32.mxu1 %vm512_vm0, %v2365_v23 }
 0x959   : > { %4239 = vmatmul.mubr.msk.f32.vlgmr.msra.gmra.mrb[8].mxu1 %vm512_vm0, %v4186_v22 }
 0x95a   : > { %v4189_v24 = vpop.f32.mrb[46].mxu0  ;;  %4466 = vmatpush3.bf16.msra.mxu1 %v4942_v47 }
 0x95b   : > { %v2375_v25 = vpop.f32.mrb[47].mxu0  ;;  %4468 = vmatprep.subr.bf16.mxu1 %v4954_v52 }
 0x95c   : > { %4241 = vmatprep.mubr.msk.f32.mxu1 %vm512_vm0, %v2375_v25 }
 0x95d   : > { %4242 = vmatmul.mubr.msk.f32.gmra.mrb[10].mxu1 %vm512_vm0, %v4189_v24 }
 0x95e   : > { %v4192_v26 = vpop.f32.mrb[48].mxu0  ;;  %4470 = vmatpush3.bf16.msra.mxu1 %v4954_v52 }
 0x95f   : > { %v2385_v27 = vpop.f32.mrb[49].mxu0  ;;  %4472 = vmatprep.subr.bf16.mxu1 %v4966_v57 }
 0x960   : > { %4252 = vmatprep.mubr.msk.f32.mxu1 %vm512_vm0, %v2385_v27 }
 0x961   : > { %4253 = vmatmul.mubr.msk.f32.vlgmr.msra.gmra.mrb[8].mxu1 %vm512_vm0, %v4192_v26 }
 0x962   : > { %v4195_v28 = vpop.f32.mrb[50].mxu0  ;;  %4474 = vmatpush3.bf16.msra.mxu1 %v4966_v57 }
 0x963   : > { %v2395_v29 = vpop.f32.mrb[51].mxu0  ;;  %4476 = vmatprep.subr.bf16.mxu1 %v4978_v62 }
 0x964   : > { %4255 = vmatprep.mubr.msk.f32.mxu1 %vm512_vm0, %v2395_v29 }
 0x965   : > { %4256 = vmatmul.mubr.msk.f32.gmra.mrb[10].mxu1 %vm512_vm0, %v4195_v28 }
 0x966   : > { %v4198_v30 = vpop.f32.mrb[52].mxu0  ;;  %4478 = vmatpush3.bf16.msra.mxu1 %v4978_v62 }
 0x967   : > { %v2405_v31 = vpop.f32.mrb[53].mxu0 }
 0x968   : > { %4266 = vmatprep.mubr.msk.f32.mxu1 %vm512_vm0, %v2405_v31 }
 0x969   : > { %4267 = vmatmul.mubr.msk.f32.vlgmr.msra.gmra.mrb[8].mxu1 %vm512_vm0, %v4198_v30 }
 0x96a   : > { %v4201_v32 = vpop.f32.mrb[54].mxu0 }
 0x96b   : > { %v2415_v33 = vpop.f32.mrb[55].mxu0 }
 0x96c   : > { %4269 = vmatprep.mubr.msk.f32.mxu1 %vm512_vm0, %v2415_v33  ;;  %v3132_v33 = vld [vmem:[%s5385_s7 + $0x10] sm:$0xff] }
 0x96d   : > { %4270 = vmatmul.mubr.msk.f32.gmra.mrb[10].mxu1 %vm512_vm0, %v4201_v32 }
 0xa3c   : > { %v4268_v34 = vpop.f32.mrb[8].mxu1 }
 0xa3d   : > { %v4511_v37 = vadd.f32 %v4268_v34, %v5020_v35  ;;  %v2902_v42 = vpop.f32.mrb[9].mxu1  ;;  %v3133_v34 = vld [vmem:[%s5385_s7 + $0x18] sm:$0xff] }
 0xa3e   : > { %v4512_v47 = vadd.f32 %v2902_v42, %v5022_v36  ;;  %v3137_v42 = vld [vmem:[%s5322_s28 + $0x18] sm:$0xff] }
 0xa3f   : > { %v3689_v52 = vmul.f32 -1.442695, %v4511_v37 }
 0xa40   : > { %v3688_v57 = vmul.f32 -1.442695, %v4512_v47  ;;  %v4271_v62 = vpop.f32.mrb[10].mxu1 }
 0xa41   : > { %4630 = vpow2.f32 %v3689_v52  ;;  %v4513_v10 = vadd.f32 %v4271_v62, %v5026_v43  ;;  %v2912_v18 = vpop.f32.mrb[11].mxu1 }
 0xa42   : > { %4632 = vpow2.f32 %v3688_v57  ;;  %v4514_v8 = vadd.f32 %v2912_v18, %v5028_v45 }
 0xa43   : > { %v3691_v59 = vmul.f32 -1.442695, %v4513_v10 }
 0xa44   : > { %v3690_v7 = vmul.f32 -1.442695, %v4514_v8 }
 0xa45   : > { %4634 = vpow2.f32 %v3691_v59 }
 0xa46   : > { %4636 = vpow2.f32 %v3690_v7 }
 0xa4b   : > { %v4631_v6 = vpop.eup %4630 }
 0xa4c   : > { %v4633_v12 = vpop.eup %4632  ;;  %v2938_v35 = vadd.f32 1.0, %v4631_v6 }
 0xa4d   : > { %v2937_v13 = vadd.f32 1.0, %v4633_v12 }
 0xa4e   : > { %4638 = vrcp.f32 %v2938_v35 }
 0xa4f   : > { %v4635_v36 = vpop.eup %4634  ;;  %4640 = vrcp.f32 %v2937_v13 }
 0xa50   : > { %v4637_v14 = vpop.eup %4636  ;;  %v2940_v16 = vadd.f32 1.0, %v4635_v36 }
 0xa51   : > { %v2939_v60 = vadd.f32 1.0, %v4637_v14 }
 0xa52   : > { %4642 = vrcp.f32 %v2940_v16 }
 0xa53   : > { %4644 = vrcp.f32 %v2939_v60  ;;  %v4680_v60 = vmov 0.0|0.0  }
 0xa54   : > { %4495 = vmatprep.subr.bf16.mxu1 %v4680_v60 }
 0xa58   : > { %v5283_v43 = vpop.eup %4638 }
 0xa59   : > { %v5285_v61 = vpop.eup %4640  ;;  %v2950_v63 = vmul.f32 %v5283_v43, %v5191_v54 }
 0xa5a   : > { %v2949_v45 = vmul.f32 %v5285_v61, %v5194_v3 }
 0xa5c   : > { %v5291_v0 = vpop.eup %4642  ;;  %4280 = vmatprep.mubr.msk.f32.mxu0 %vm512_vm0, %v2949_v45 }
 0xa5d   : > { %v5294_v46 = vpop.eup %4644  ;;  %4281 = vmatmul.mubr.msk.f32.vlgmr.msra.gmra.mrb[56].mxu0 %vm512_vm0, %v2950_v63  ;;  %v2952_v41 = vmul.f32 %v5291_v0, %v5201_v38 }
 0xa5e   : > { %v2951_v50 = vmul.f32 %v5294_v46, %v5206_v1  ;;  %4287 = vmatpush3.msra.mxu0 %v3138_v5 }
 0xa5f   : > { %4488 = vmatprep.subr.bf16.mxu0 %v4487_v20 }
 0xa60   : > { %4283 = vmatprep.mubr.msk.f32.mxu0 %vm512_vm0, %v2951_v50 }
 0xa61   : > { %4284 = vmatmul.mubr.msk.f32.gmra.mrb[58].mxu0 %vm512_vm0, %v2952_v41 }
 0xa62   : > { %4288 = vmatprep.mubr.msk.f32.mxu0 %vm3139_vm1, %v3134_v9 }
 0xa65   : > { %4289 = vmatmul.mubr.msk.f32.vlgmr.msra.gmra.mrb[60].mxu0 %vm3139_vm1, %v3135_v19 }
 0xa66   : > { %4490 = vmatpush3.bf16.msra.mxu0 %v4487_v20  ;;  %4291 = vmatprep.mubr.msk.f32.mxu0 %vm3139_vm1, %v3136_v21  ;;  %v3369_v20 = vld [vmem:[%s5388_s10] sm:$0x1]  ;;  %v3376_v21 = vlaneseq }
 0xa69   : > { %4292 = vmatmul.mubr.msk.f32.gmra.mrb[62].mxu0 %vm3139_vm1, %v3137_v42 }
 0xb30   : > { %v4282_v11 = vpop.f32.mrb[56].mxu0 }
 0xb31   : > { %3056 = vrot.lane.b32.xlu1 %v4282_v11, %s4678_s18  ;;  %v3031_v55 = vpop.f32.mrb[57].mxu0 }
 0xb32   : > { %3054 = vrot.lane.b32.xlu0 %v3031_v55, %s4678_s18 }
 0xb34   : > { %v4285_v58 = vpop.f32.mrb[58].mxu0 }
 0xb35   : > { %3060 = vrot.lane.b32.xlu1 %v4285_v58, %s4678_s18  ;;  %v3041_v39 = vpop.f32.mrb[59].mxu0 }
 0xb36   : > { %3058 = vrot.lane.b32.xlu0 %v3041_v39, %s4678_s18 }
 0xb39   : > { %3076 = vrot.lane.b32.xlu1 %v5191_v54, %s4678_s18 }
 0xb3a   : > { %3074 = vrot.lane.b32.xlu0 %v5194_v3, %s4678_s18 }
 0xb3d   : > { %3080 = vrot.lane.b32.xlu1 %v5201_v38, %s4678_s18 }
 0xb3e   : > { %3078 = vrot.lane.b32.xlu0 %v5206_v1, %s4678_s18 }
 0xba3   : > { %v3057_v49 = vpop.permute.xlu1 %3056 }
 0xba4   : > { %v3067_v51 = vadd.f32 %v4511_v37, %v3057_v49  ;;  %v3055_v40 = vpop.permute.xlu0 %3054  ;;  %v4491_v37 = vpack.c.bf16 %v3133_v34, %v3132_v33 }
 0xba5   : > { %v3066_v44 = vadd.f32 %v4512_v47, %v3055_v40 }
 0xba6   : > { %4646 = vtanh.f32 %v3067_v51  ;;  %4492 = vmatprep.subr.bf16.mxu0 %v4491_v37 }
 0xba7   : > { %4648 = vtanh.f32 %v3066_v44  ;;  %v3061_v48 = vpop.permute.xlu1 %3060  ;;  %4494 = vmatpush3.bf16.msra.mxu0 %v4491_v37 }
 0xba8   : > { %v3069_v17 = vadd.f32 %v4513_v10, %v3061_v48  ;;  %v3059_v53 = vpop.permute.xlu0 %3058 }
 0xba9   : > { %v3068_v4 = vadd.f32 %v4514_v8, %v3059_v53 }
 0xbaa   : > { %4650 = vtanh.f32 %v3069_v17 }
 0xbab   : > { %4652 = vtanh.f32 %v3068_v4  ;;  %v3077_v56 = vpop.permute.xlu1 %3076 }
 0xbac   : > { %v3075_v22 = vpop.permute.xlu0 %3074 }
 0xbaf   : > { %v3081_v28 = vpop.permute.xlu1 %3080 }
 0xbb0   : > { %v4647_v23 = vpop.eup %4646  ;;  %v3079_v31 = vpop.permute.xlu0 %3078 }
 0xbb1   : > { %v4649_v24 = vpop.eup %4648  ;;  %v3087_v25 = vsub.f32 %v4647_v23, %v3077_v56 }
 0xbb2   : > { %v3086_v26 = vsub.f32 %v4649_v24, %v3075_v22  ;;  %v3377_v22 = vshrl.u32 %v3376_v21, 7 }
 0xbb3   : > { %3096 = vrot.lane.b32.xlu1 %v3087_v25, %s4679_s19 }
 0xbb4   : > { %v4651_v27 = vpop.eup %4650  ;;  %3094 = vrot.lane.b32.xlu0 %v3086_v26, %s4679_s19  ;;  %v3378_v23 = vsub.s32 0, %v3377_v22 }
 0xbb5   : > { %v4653_v29 = vpop.eup %4652  ;;  %v3089_v30 = vsub.f32 %v4651_v27, %v3081_v28 }
 0xbb6   : > { %v3088_v32 = vsub.f32 %v4653_v29, %v3079_v31 }
 0xbb7   : > { %3100 = vrot.lane.b32.xlu1 %v3089_v30, %s4679_s19 }
 0xbb8   : > { %3098 = vrot.lane.b32.xlu0 %v3088_v32, %s4679_s19 }
 0xc25   : > { %v3097_v47 = vpop.permute.xlu1 %3096 }
 0xc26   : > { %v3107_v52 = vmul.f32 %v5283_v43, %v3097_v47  ;;  %v3095_v57 = vpop.permute.xlu0 %3094  ;;  %v4683_v43 = vmov 0  }
 0xc27   : > { %v3106_v62 = vmul.f32 %v5285_v61, %v3095_v57  ;;  %4581 = vset.pattern.permute.xlu0 %v4683_v43  ;;  %v3704_v61 = vld [vmem:[%s5387_s9] ss:$0 sm:$0xff] }
 0xc28   : > { %3116 = vrot.lane.b32.xlu1 %v3107_v52, %s4679_s19 }
 0xc29   : > { %v3101_v10 = vpop.permute.xlu1 %3100  ;;  %3114 = vrot.lane.b32.xlu0 %v3106_v62, %s4679_s19 }
 0xc2a   : > { %v3109_v18 = vmul.f32 %v5291_v0, %v3101_v10  ;;  %v3099_v8 = vpop.permute.xlu0 %3098 }
 0xc2b   : > { %v3108_v59 = vmul.f32 %v5294_v46, %v3099_v8 }
 0xc2c   : > { %3120 = vrot.lane.b32.xlu1 %v3109_v18, %s4679_s19 }
 0xc2d   : > { %3118 = vrot.lane.b32.xlu0 %v3108_v59, %s4679_s19 }
 0xc9a   : > { %v3117_v7 = vpop.permute.xlu1 %3116 }
 0xc9b   : > { %v3115_v6 = vpop.permute.xlu0 %3114  ;;  %v3127_v35 = vadd.f32 %v3117_v7, %v5191_v54  ;;  %v3370_v54 = vld [vmem:[#allocation2] sm:$0x1] }
 0xc9c   : > { %v3126_v12 = vadd.f32 %v3115_v6, %v5194_v3  ;;  %v4682_v3 = vmov 0.0   ;;  %3373 = vperm.xlu0 %4581, %v3370_v54  }
 0xc9d   : > { %4316 = vmatprep.mubr.msk.f32.mxu1 %vm4681_vm2, %v4682_v3 }
 0xc9e   : > { %v3121_v13 = vpop.permute.xlu1 %3120  ;;  %4302 = vmatprep.mubr.msk.f32.mxu0 %vm512_vm0, %v3126_v12 }
 0xc9f   : > { %4303 = vmatmul.mubr.msk.f32.vlgmr.msra.gmra.mrb[60].mxu0 %vm512_vm0, %v3127_v35  ;;  %v3119_v36 = vpop.permute.xlu0 %3118  ;;  %v3129_v16 = vadd.f32 %v3121_v13, %v5201_v38 }
 0xca0   : > { %v3128_v14 = vadd.f32 %v3119_v36, %v5206_v1 }
 0xca2   : > { %4305 = vmatprep.mubr.msk.f32.mxu0 %vm512_vm0, %v3128_v14 }
 0xca3   : > { %4306 = vmatmul.mubr.msk.f32.gmra.mrb[62].mxu0 %vm512_vm0, %v3129_v16 }
 0xd1b   : > { %v3374_v24 = vpop.permute.xlu0 %3373 }
 0xd1c   : > { %v3379_v25 = vrot.slane %v3374_v24, %v3378_v23 }
 0xd72   : > { %v4304_v1 = vpop.f32.mrb[60].mxu0 }
 0xd73   : > { %v3342_v45 = vadd.f32 %v4304_v1, %v3704_v61  ;;  %v3315_v38 = vpop.f32.mrb[61].mxu0 }
 0xd74   : > { %v3341_v63 = vadd.f32 %v3704_v61, %v3315_v38 }
 0xd75   : > { %v3706_v0 = vmul.f32 -1.442695, %v3342_v45 }
 0xd76   : > { %v3705_v46 = vmul.f32 -1.442695, %v3341_v63  ;;  %v4307_v50 = vpop.f32.mrb[62].mxu0 }
 0xd77   : > { %4654 = vpow2.f32 %v3706_v0  ;;  %v3344_v41 = vadd.f32 %v4307_v50, %v3704_v61  ;;  %v3325_v11 = vpop.f32.mrb[63].mxu0 }
 0xd78   : > { %4656 = vpow2.f32 %v3705_v46  ;;  %v3343_v55 = vadd.f32 %v3704_v61, %v3325_v11 }
 0xd79   : > { %v3708_v58 = vmul.f32 -1.442695, %v3344_v41 }
 0xd7a   : > { %v3707_v39 = vmul.f32 -1.442695, %v3343_v55 }
 0xd7b   : > { %4658 = vpow2.f32 %v3708_v58 }
 0xd7c   : > { %4660 = vpow2.f32 %v3707_v39 }
 0xd81   : > { %v4655_v49 = vpop.eup %4654 }
 0xd82   : > { %v4657_v51 = vpop.eup %4656  ;;  %v3358_v40 = vadd.f32 1.0, %v4655_v49 }
 0xd83   : > { %v3357_v44 = vadd.f32 1.0, %v4657_v51 }
 0xd84   : > { %4662 = vrcp.f32 %v3358_v40 }
 0xd85   : > { %v4659_v48 = vpop.eup %4658  ;;  %4664 = vrcp.f32 %v3357_v44 }
 0xd86   : > { %v4661_v17 = vpop.eup %4660  ;;  %v3360_v53 = vadd.f32 1.0, %v4659_v48 }
 0xd87   : > { %v3359_v4 = vadd.f32 1.0, %v4661_v17 }
 0xd88   : > { %4666 = vrcp.f32 %v3360_v53 }
 0xd89   : > { %4668 = vrcp.f32 %v3359_v4 }
 0xd8e   : > { %v4663_v5 = vpop.eup %4662 }
 0xd8f   : > { %v4665_v15 = vpop.eup %4664 }
 0xd90   : > { %v4496_v2 = vpack.c.bf16 %v4663_v5, %v4665_v15 }
 0xd92   : > { %v4667_v56 = vpop.eup %4666  ;;  %4498 = vmatpush3.bf16.xpose.msk.msra.mxu1 %vm4497_vm4, %v4496_v2 }
 0xd93   : > { %v4669_v9 = vpop.eup %4668  ;;  %4499 = vmatprep.subr.bf16.mxu1 %v4680_v60 }
 0xd94   : > { %v4500_v19 = vpack.c.bf16 %v4667_v56, %v4669_v9 }
 0xd9a   : > { %4502 = vmatpush3.bf16.xpose.msk.msra.mxu1 %vm4497_vm4, %v4500_v19 }
 0xda1   : > { %4317 = vmatmul.mubr.msk.f32.vlgmr.msra.gmra.mrb[12].mxu1 %vm3380_vm3, %v3369_v20 }
 0xe74   : > { %v3462_v26 = vpop.f32.mrb[12].mxu1 }
 0xe75   : > { %v3463_v27 = vadd.f32 %v3462_v26, %v3379_v25  ;;  %v4318_v28 = vpop.f32.mrb[13].mxu1 }
 0xe77   : > { %3467 = vst.msk [vmem:[%s479_s26] sm:$0x1] %vm3466_vm5, %v3463_v27 }
 0xe78 PF: > { %s24_s23 = sadd.s32 1, %s4676_s23  }
 0xe79   : > { %p21_p6 = scmp.ge.s32.totalorder %s24_s23, 4  }
 0xe7b   :  { %23 = sbr.rel (!%p21_p6) target bundleno = 3 (0x3), region = 107 }

</bundles_post_ra>
